<compile_context>
chip_gen: v5e
topology: v5e:2x2
jax: 0.10.0
libtpu: 0.0.40
codegen_flags: <defaults>
</compile_context>

<pallas_src>
import math

import jax
import jax.numpy as jnp
from jax.experimental import pallas as pl
from jax.experimental.pallas import tpu as pltpu


def _round_up(x, m):
    return ((x + m - 1) // m) * m


def _vmem_capacity_bytes():
    try:
        return int(pltpu.get_tpu_info().vmem_capacity_bytes)
    except Exception:
        return 64 * 1024 * 1024  # conservative default (v7x per-TensorCore)


def _lm_head_kernel(eps):
    inv_sqrt2 = 1.0 / math.sqrt(2.0)

    def kernel(x_ref, wd_ref, bd_ref, g_ref, b_ref, wdec_ref, bdec_ref,
               o_ref, h_ref):
        # dense + GELU + LayerNorm once per row tile (vocab tile 0); the result
        # lives in a VMEM scratch reused by every vocab tile of this row tile.
        @pl.when(pl.program_id(1) == 0)
        def _():
            h = jnp.dot(x_ref[...], wd_ref[...],
                        preferred_element_type=jnp.float32)
            h = h + bd_ref[...].astype(jnp.float32)
            # exact erf-form GELU (matches the PyTorch reference gelu()).
            h = h * 0.5 * (1.0 + jax.lax.erf(h * inv_sqrt2))
            # LayerNorm over the hidden dim (biased variance, like torch).
            mean = jnp.mean(h, axis=-1, keepdims=True)
            c = h - mean
            var = jnp.mean(c * c, axis=-1, keepdims=True)
            h = c * jax.lax.rsqrt(var + eps)
            h = h * g_ref[...].astype(jnp.float32) + b_ref[...].astype(jnp.float32)
            # Note: post-LN activations are stored in bf16 (matches the
            # mixed-precision contract; diverges from a pure-f32 forward only
            # by bf16 rounding of the LN output).
            h_ref[...] = h.astype(h_ref.dtype)

        # decoder: (tm, H) @ (H, tn) + (1, tn) -- pure MXU stream per vocab tile.
        out = jnp.dot(h_ref[...], wdec_ref[...],
                      preferred_element_type=jnp.float32)
        out = out + bdec_ref[...].astype(jnp.float32)
        o_ref[...] = out.astype(o_ref.dtype)

    return kernel


def prepare_lm_head_params(params, *, matmul_dtype=jnp.bfloat16, tn=512):
    """One-time weight cast + vocab pad.

    Call this OUTSIDE the per-step hot path: it avoids re-writing the (H, V)
    decoder weight (~77-150 MB for RoBERTa vocabularies) to HBM on every
    forward call.
    """
    H = params["w_dense"].shape[0]
    V = params["w_dec"].shape[1]
    # tn: multiple of 256 (256-wide MXU on v6e/v7x), >= 256, no larger than the
    # 256-aligned vocab size; 512 keeps vocab padding waste < ~1%.
    tn = max(256, min(int(tn), _round_up(V, 256)))
    V_pad = _round_up(V, tn)
    w_dec = params["w_dec"].astype(matmul_dtype)                    # (H, V)
    b_dec = params["b_dec"].reshape(1, V).astype(jnp.float32)       # tied bias
    if V_pad != V:
        w_dec = jnp.pad(w_dec, ((0, 0), (0, V_pad - V)))
        b_dec = jnp.pad(b_dec, ((0, 0), (0, V_pad - V)))
    # TODO(synk): optional int8 (v5e/v6e) / fp8 (v7x) decoder weight with
    # per-column scales would halve the dominant weight stream again; left out
    # because it changes numerics and needs an accuracy gate.
    return {
        "w_dense": params["w_dense"].astype(matmul_dtype),          # (H, H)
        "b_dense": params["b_dense"].reshape(1, H).astype(jnp.float32),
        "ln_gamma": params["ln_gamma"].reshape(1, H).astype(jnp.float32),
        "ln_beta": params["ln_beta"].reshape(1, H).astype(jnp.float32),
        "w_dec": w_dec,                                             # (H, V_pad)
        "b_dec": b_dec,                                             # (1, V_pad)
        "vocab_size": int(V),
        "tn": int(tn),
        "matmul_dtype": jnp.dtype(matmul_dtype),
    }


# Capability flag for pl.Buffered(1) on grid-constant operands; resolved on the
# first call and cached so an unsupported jax version pays at most one retry.
_SINGLE_BUFFER_CONSTS_OK = True


def _const_spec(shape, single_buffer):
    """BlockSpec for a grid-constant operand (block index never changes)."""
    idx = lambda i, j: (0, 0)
    if single_buffer:
        try:
            # The second pipeline buffer would be dead VMEM -> request 1 buffer.
            return pl.BlockSpec(shape, idx, pipeline_mode=pl.Buffered(1))
        except Exception:
            pass
    return pl.BlockSpec(shape, idx)


def roberta_lm_head(features, params, *, eps=1e-5, tm=1024, tn=None,
                    matmul_dtype=jnp.bfloat16, out_dtype=jnp.bfloat16,
                    return_padded=False):
    """features: (B, S, H). Returns logits (B, S, V).

    If return_padded=True, returns the raw (M_pad, V_pad) 2-D buffer (skips the
    slice copy); rows >= B*S and cols >= V are padding and must be masked.
    """
    global _SINGLE_BUFFER_CONSTS_OK

    if "vocab_size" not in params:  # raw params -> prepare per call (slow path)
        params = prepare_lm_head_params(
            params, matmul_dtype=matmul_dtype, tn=512 if tn is None else tn)

    B, S, H = features.shape
    assert H % 128 == 0, "hidden size must be a multiple of 128"
    matmul_dtype = params["matmul_dtype"]
    tn = int(params["tn"])
    V = int(params["vocab_size"])
    V_pad = params["w_dec"].shape[1]

    M = B * S
    mm_b = int(jnp.dtype(matmul_dtype).itemsize)
    out_b = int(jnp.dtype(out_dtype).itemsize)

    # --- Row tile selection --------------------------------------------------
    # Bigger tm = higher arithmetic intensity on the re-streamed decoder weight
    # (tm FLOP/byte); clamp to the problem size, keep a multiple of 8.
    tm = max(8, min(int(tm), _round_up(M, 8)))
    # Keep >= 2 row tiles so both v7x TensorCores / megacore halves get work.
    if M >= 16:
        tm = min(tm, _round_up((M + 1) // 2, 8))

    # Fit the working set into a generation-aware VMEM budget (leave headroom
    # for compiler-internal scratch). Constants counted double-buffered so the
    # estimate stays safe even if pl.Buffered(1) is unavailable.
    def vmem_needed(tm_):
        const = 2 * (H * H * mm_b + 3 * H * 4)
        streamed = 2 * (tm_ * H * mm_b + H * tn * mm_b + tn * 4
                        + tm_ * tn * out_b)
        scratch = tm_ * H * mm_b
        return const + streamed + scratch

    budget = (_vmem_capacity_bytes() * 3) // 4
    while vmem_needed(tm) > budget and tm > 8:
        tm = max(8, _round_up(tm // 2, 8))

    # Prefer a tm that divides M exactly: avoids padded rows and, more
    # importantly, the full extra HBM pass from the `out[:M]` slice copy.
    if M % tm != 0:
        best = 0
        for cand in range((tm // 8) * 8, 7, -8):
            if M % cand == 0:
                best = cand
                break
        if best >= max(8, tm // 2):
            tm = best
    M_pad = _round_up(M, tm)

    n_row_tiles = M_pad // tm
    n_voc_tiles = V_pad // tn

    # --- Inputs ----------------------------------------------------------------
    x2d = features.reshape(M, H).astype(matmul_dtype)
    if M_pad != M:
        x2d = jnp.pad(x2d, ((0, M_pad - M), (0, 0)))

    cost = pl.CostEstimate(
        flops=int(2 * M_pad * H * (H + V_pad)),
        transcendentals=int(M_pad * H),                  # erf in GELU
        bytes_accessed=int(M_pad * H * mm_b              # activations read
                           + H * H * mm_b                # dense weight
                           + n_row_tiles * (H * V_pad * mm_b + V_pad * 4)
                           + M_pad * V_pad * out_b))     # logits write

    vmem_limit = int(min(_vmem_capacity_bytes(),
                         max(32 * 1024 * 1024, vmem_needed(tm) + (8 << 20))))

    def _run(single_buffer_consts):
        grid_spec = pltpu.PrefetchScalarGridSpec(
            num_scalar_prefetch=0,
            grid=(n_row_tiles, n_voc_tiles),
            in_specs=[
                pl.BlockSpec((tm, H), lambda i, j: (i, 0)),        # x row tile
                _const_spec((H, H), single_buffer_consts),         # dense W
                _const_spec((1, H), single_buffer_consts),         # dense b
                _const_spec((1, H), single_buffer_consts),         # LN gamma
                _const_spec((1, H), single_buffer_consts),         # LN beta
                # Decoder weight tile: the only per-step HBM stream. If a
                # profile shows DMA bubbles at vocab-tile boundaries, switch to
                # pipeline_mode=pl.Buffered(3) (check v7x VMEM headroom first).
                pl.BlockSpec((H, tn), lambda i, j: (0, j)),
                pl.BlockSpec((1, tn), lambda i, j: (0, j)),        # decoder b
            ],
            out_specs=pl.BlockSpec((tm, tn), lambda i, j: (i, j)),
            scratch_shapes=[pltpu.VMEM((tm, H), matmul_dtype)],
        )
        return pl.pallas_call(
            _lm_head_kernel(eps),
            out_shape=jax.ShapeDtypeStruct((M_pad, V_pad), out_dtype),
            grid_spec=grid_spec,
            compiler_params=pltpu.CompilerParams(
                dimension_semantics=("parallel", "arbitrary"),
                vmem_limit_bytes=vmem_limit,
            ),
            cost_estimate=cost,
        )(x2d, params["w_dense"], params["b_dense"], params["ln_gamma"],
          params["ln_beta"], params["w_dec"], params["b_dec"])

    if _SINGLE_BUFFER_CONSTS_OK:
        try:
            out = _run(True)
        except Exception:
            # pl.Buffered(1) rejected by this jax/Mosaic version; fall back to
            # default double-buffered constants (costs only ~1-4 MiB VMEM).
            _SINGLE_BUFFER_CONSTS_OK = False
            out = _run(False)
    else:
        out = _run(False)

    if return_padded:
        return out
    return out[:M, :V].reshape(B, S, V)


def _reference_mixed(features, params, eps=1e-5, mm=jnp.bfloat16):
    """Reference mirroring the kernel's mixed precision (bf16 MXU, f32 acc)."""
    B, S, H = features.shape
    x = features.reshape(B * S, H).astype(mm)
    h = jnp.dot(x, params["w_dense"].astype(mm),
                preferred_element_type=jnp.float32)
    h = h + params["b_dense"].reshape(1, H).astype(jnp.float32)
    h = h * 0.5 * (1.0 + jax.lax.erf(h / math.sqrt(2.0)))
    mean = jnp.mean(h, axis=-1, keepdims=True)
    var = jnp.mean((h - mean) ** 2, axis=-1, keepdims=True)
    h = (h - mean) * jax.lax.rsqrt(var + eps)
    h = h * params["ln_gamma"].reshape(1, H) + params["ln_beta"].reshape(1, H)
    o = jnp.dot(h.astype(mm), params["w_dec"].astype(mm),
                preferred_element_type=jnp.float32)
    o = o + params["b_dec"].reshape(1, -1)
    return o.reshape(B, S, -1)


def _reference_f32(features, params, eps=1e-5):
    x = features @ params["w_dense"] + params["b_dense"].reshape(1, -1)
    x = x * 0.5 * (1.0 + jax.lax.erf(x / math.sqrt(2.0)))
    mean = jnp.mean(x, axis=-1, keepdims=True)
    var = jnp.mean((x - mean) ** 2, axis=-1, keepdims=True)
    x = (x - mean) * jax.lax.rsqrt(var + eps)
    x = x * params["ln_gamma"].reshape(1, -1) + params["ln_beta"].reshape(1, -1)
    return x @ params["w_dec"] + params["b_dec"].reshape(1, -1)


if __name__ == "__main__":
    # Small config exercising both row and vocab padding: H=128, V=300, B*S=20.
    B, S, H, V = 2, 10, 128, 300
    eps = 1e-5

    key = jax.random.PRNGKey(0)
    k = jax.random.split(key, 4)

    # Parameter shapes per RobertaLMHead.__init__ (weights stored transposed as
    # (in_features, out_features); decoder bias tied to self.bias = zeros(V)).
    params = {
        "w_dense": jax.random.normal(k[0], (H, H), jnp.float32) * 0.02,
        "b_dense": jax.random.normal(k[1], (1, H), jnp.float32) * 0.02,
        "ln_gamma": jnp.ones((1, H), jnp.float32),
        "ln_beta": jnp.zeros((1, H), jnp.float32),
        "w_dec": jax.random.normal(k[2], (H, V), jnp.float32) * 0.02,
        "b_dec": jnp.zeros((1, V), jnp.float32),
    }
    features = jax.random.normal(k[3], (B, S, H), jnp.float32)

    # One-time weight preparation (cast + vocab pad) outside the hot path.
    prepped = prepare_lm_head_params(params, matmul_dtype=jnp.bfloat16, tn=512)

    # Default path: bf16 logits (halves the dominant logits HBM stream).
    logits = roberta_lm_head(features, prepped, eps=eps)
    logits = jax.block_until_ready(logits)
    assert logits.shape == (B, S, V)
    assert logits.dtype == jnp.bfloat16
    assert jnp.all(jnp.isfinite(logits.astype(jnp.float32))), "non-finite logits"

    ref_mixed = _reference_mixed(features, params, eps=eps)
    assert jnp.allclose(logits.astype(jnp.float32), ref_mixed,
                        atol=2e-2, rtol=2e-2), \
        "bf16-logits mismatch vs mixed-precision reference"

    # Strict check: f32 logits vs an identically-mixed-precision reference.
    logits_f32 = roberta_lm_head(features, prepped, eps=eps,
                                 out_dtype=jnp.float32)
    logits_f32 = jax.block_until_ready(logits_f32)
    assert logits_f32.shape == (B, S, V)
    assert jnp.allclose(logits_f32, ref_mixed, atol=2e-3, rtol=2e-3), \
        "mismatch vs mixed-precision reference"

    # Loose sanity check against the pure-f32 reference (bf16 MXU rounding).
    ref_f32 = _reference_f32(features, params, eps=eps)
    assert jnp.allclose(logits_f32, ref_f32, atol=3e-2, rtol=3e-2), \
        "mismatch vs f32 reference"

    print("KERNEL_OK")
</pallas_src>

<mosaic_0001>
module attributes {stable_mosaic.version = 11 : i64} {
  func.func @kernel(%arg0: i32, %arg1: i32, %arg2: memref<16x128xbf16, #tpu.memory_space<vmem>>, %arg3: memref<128x128xbf16, #tpu.memory_space<vmem>>, %arg4: memref<1x128xf32, #tpu.memory_space<vmem>>, %arg5: memref<1x128xf32, #tpu.memory_space<vmem>>, %arg6: memref<1x128xf32, #tpu.memory_space<vmem>>, %arg7: memref<128x512xbf16, #tpu.memory_space<vmem>>, %arg8: memref<1x512xf32, #tpu.memory_space<vmem>>, %arg9: memref<16x512xbf16, #tpu.memory_space<vmem>>, %arg10: memref<16x128xbf16, #tpu.memory_space<vmem>>) attributes {dimension_semantics = [#tpu.dimension_semantics<parallel>, #tpu.dimension_semantics<arbitrary>], iteration_bounds = array<i64: 2, 1>, scalar_prefetch = 0 : i64, scratch_operands = 1 : i64, tpu.core_type = #tpu.core_type<tc>, window_params = [{transform_indices = @transform_0, window_bounds = array<i64: 16, 128>}, {pipeline_mode = #tpu.pipeline_mode<synchronous>, transform_indices = @transform_1, window_bounds = array<i64: 128, 128>}, {pipeline_mode = #tpu.pipeline_mode<synchronous>, transform_indices = @transform_2, window_bounds = array<i64: 1, 128>}, {pipeline_mode = #tpu.pipeline_mode<synchronous>, transform_indices = @transform_3, window_bounds = array<i64: 1, 128>}, {pipeline_mode = #tpu.pipeline_mode<synchronous>, transform_indices = @transform_4, window_bounds = array<i64: 1, 128>}, {transform_indices = @transform_5, window_bounds = array<i64: 128, 512>}, {transform_indices = @transform_6, window_bounds = array<i64: 1, 512>}, {transform_indices = @transform_7, window_bounds = array<i64: 16, 512>}]} {
    %c0_i32 = arith.constant 0 : i32
    %0 = arith.cmpi eq, %arg1, %c0_i32 : i32
    %1 = arith.extui %0 : i1 to i32
    %c0_i32_0 = arith.constant 0 : i32
    %2 = arith.cmpi ne, %1, %c0_i32_0 : i32
    scf.if %2 {
      %c0_8 = arith.constant 0 : index
      %c0_9 = arith.constant 0 : index
      %11 = vector.load %arg2[%c0_8, %c0_9] : memref<16x128xbf16, #tpu.memory_space<vmem>>, vector<16x128xbf16>
      %c0_10 = arith.constant 0 : index
      %c0_11 = arith.constant 0 : index
      %12 = vector.load %arg3[%c0_10, %c0_11] : memref<128x128xbf16, #tpu.memory_space<vmem>>, vector<128x128xbf16>
      %cst_12 = arith.constant dense<0.000000e+00> : vector<16x128xf32>
      %13 = tpu.matmul %11, %12, %cst_12 {dimension_numbers = #tpu.dot_dimension_numbers<[1], [0], [0], [1], [0, 0, 1, 1], [], []>} : vector<16x128xbf16>, vector<128x128xbf16>, vector<16x128xf32> -> vector<16x128xf32>
      %c0_13 = arith.constant 0 : index
      %c0_14 = arith.constant 0 : index
      %14 = vector.load %arg4[%c0_13, %c0_14] : memref<1x128xf32, #tpu.memory_space<vmem>>, vector<1x128xf32>
      %15 = vector.broadcast %14 : vector<1x128xf32> to vector<16x128xf32>
      %16 = arith.addf %13, %15 : vector<16x128xf32>
      %cst_15 = arith.constant 5.000000e-01 : f32
      %17 = vector.broadcast %cst_15 : f32 to vector<16x128xf32>
      %18 = arith.mulf %16, %17 : vector<16x128xf32>
      %cst_16 = arith.constant 0.707106769 : f32
      %19 = vector.broadcast %cst_16 : f32 to vector<16x128xf32>
      %20 = arith.mulf %16, %19 : vector<16x128xf32>
      %21 = math.erf %20 : vector<16x128xf32>
      %cst_17 = arith.constant 1.000000e+00 : f32
      %22 = vector.broadcast %cst_17 : f32 to vector<16x128xf32>
      %23 = arith.addf %22, %21 : vector<16x128xf32>
      %24 = arith.mulf %18, %23 : vector<16x128xf32>
      %cst_18 = arith.constant dense<0.000000e+00> : vector<16xf32>
      %25 = vector.multi_reduction <add>, %24, %cst_18 [1] : vector<16x128xf32> to vector<16xf32>
      %26 = vector.shape_cast %25 : vector<16xf32> to vector<16x1xf32>
      %cst_19 = arith.constant 1.280000e+02 : f32
      %27 = vector.broadcast %cst_19 : f32 to vector<16x1xf32>
      %28 = arith.divf %26, %27 : vector<16x1xf32>
      %29 = vector.broadcast %28 : vector<16x1xf32> to vector<16x128xf32>
      %30 = arith.subf %24, %29 : vector<16x128xf32>
      %31 = arith.mulf %30, %30 : vector<16x128xf32>
      %cst_20 = arith.constant dense<0.000000e+00> : vector<16xf32>
      %32 = vector.multi_reduction <add>, %31, %cst_20 [1] : vector<16x128xf32> to vector<16xf32>
      %33 = vector.shape_cast %32 : vector<16xf32> to vector<16x1xf32>
      %cst_21 = arith.constant 1.280000e+02 : f32
      %34 = vector.broadcast %cst_21 : f32 to vector<16x1xf32>
      %35 = arith.divf %33, %34 : vector<16x1xf32>
      %cst_22 = arith.constant 9.99999974E-6 : f32
      %36 = vector.broadcast %cst_22 : f32 to vector<16x1xf32>
      %37 = arith.addf %35, %36 : vector<16x1xf32>
      %38 = math.rsqrt %37 : vector<16x1xf32>
      %39 = vector.broadcast %38 : vector<16x1xf32> to vector<16x128xf32>
      %40 = arith.mulf %30, %39 : vector<16x128xf32>
      %c0_23 = arith.constant 0 : index
      %c0_24 = arith.constant 0 : index
      %41 = vector.load %arg5[%c0_23, %c0_24] : memref<1x128xf32, #tpu.memory_space<vmem>>, vector<1x128xf32>
      %42 = vector.broadcast %41 : vector<1x128xf32> to vector<16x128xf32>
      %43 = arith.mulf %40, %42 : vector<16x128xf32>
      %c0_25 = arith.constant 0 : index
      %c0_26 = arith.constant 0 : index
      %44 = vector.load %arg6[%c0_25, %c0_26] : memref<1x128xf32, #tpu.memory_space<vmem>>, vector<1x128xf32>
      %45 = vector.broadcast %44 : vector<1x128xf32> to vector<16x128xf32>
      %46 = arith.addf %43, %45 : vector<16x128xf32>
      %47 = arith.truncf %46 : vector<16x128xf32> to vector<16x128xbf16>
      %c0_27 = arith.constant 0 : index
      %c0_28 = arith.constant 0 : index
      %48 = vector.load %arg10[%c0_27, %c0_28] : memref<16x128xbf16, #tpu.memory_space<vmem>>, vector<16x128xbf16>
      tpu.vector_store %arg10[%c0_27, %c0_28], %47 {strides = array<i32>} : memref<16x128xbf16, #tpu.memory_space<vmem>>, vector<16x128xbf16>,
    } else {
    }
    %c0 = arith.constant 0 : index
    %c0_1 = arith.constant 0 : index
    %3 = vector.load %arg10[%c0, %c0_1] : memref<16x128xbf16, #tpu.memory_space<vmem>>, vector<16x128xbf16>
    %c0_2 = arith.constant 0 : index
    %c0_3 = arith.constant 0 : index
    %4 = vector.load %arg7[%c0_2, %c0_3] : memref<128x512xbf16, #tpu.memory_space<vmem>>, vector<128x512xbf16>
    %cst = arith.constant dense<0.000000e+00> : vector<16x512xf32>
    %5 = tpu.matmul %3, %4, %cst {dimension_numbers = #tpu.dot_dimension_numbers<[1], [0], [0], [1], [0, 0, 1, 1], [], []>} : vector<16x128xbf16>, vector<128x512xbf16>, vector<16x512xf32> -> vector<16x512xf32>
    %c0_4 = arith.constant 0 : index
    %c0_5 = arith.constant 0 : index
    %6 = vector.load %arg8[%c0_4, %c0_5] : memref<1x512xf32, #tpu.memory_space<vmem>>, vector<1x512xf32>
    %7 = vector.broadcast %6 : vector<1x512xf32> to vector<16x512xf32>
    %8 = arith.addf %5, %7 : vector<16x512xf32>
    %9 = arith.truncf %8 : vector<16x512xf32> to vector<16x512xbf16>
    %c0_6 = arith.constant 0 : index
    %c0_7 = arith.constant 0 : index
    %10 = vector.load %arg9[%c0_6, %c0_7] : memref<16x512xbf16, #tpu.memory_space<vmem>>, vector<16x512xbf16>
    tpu.vector_store %arg9[%c0_6, %c0_7], %9 {strides = array<i32>} : memref<16x512xbf16, #tpu.memory_space<vmem>>, vector<16x512xbf16>,
    return
  }
  func.func @transform_0(%arg0: i32, %arg1: i32) -> (i32, i32) {
    %c0_i32 = arith.constant 0 : i32
    %c0_i32_0 = arith.constant 0 : i32
    return %arg0, %c0_i32 : i32, i32
  }
  func.func @transform_1(%arg0: i32, %arg1: i32) -> (i32, i32) {
    %c0_i32 = arith.constant 0 : i32
    %c0_i32_0 = arith.constant 0 : i32
    %c0_i32_1 = arith.constant 0 : i32
    return %c0_i32, %c0_i32_0 : i32, i32
  }
  func.func @transform_2(%arg0: i32, %arg1: i32) -> (i32, i32) {
    %c0_i32 = arith.constant 0 : i32
    %c0_i32_0 = arith.constant 0 : i32
    %c0_i32_1 = arith.constant 0 : i32
    return %c0_i32, %c0_i32_0 : i32, i32
  }
  func.func @transform_3(%arg0: i32, %arg1: i32) -> (i32, i32) {
    %c0_i32 = arith.constant 0 : i32
    %c0_i32_0 = arith.constant 0 : i32
    %c0_i32_1 = arith.constant 0 : i32
    return %c0_i32, %c0_i32_0 : i32, i32
  }
  func.func @transform_4(%arg0: i32, %arg1: i32) -> (i32, i32) {
    %c0_i32 = arith.constant 0 : i32
    %c0_i32_0 = arith.constant 0 : i32
    %c0_i32_1 = arith.constant 0 : i32
    return %c0_i32, %c0_i32_0 : i32, i32
  }
  func.func @transform_5(%arg0: i32, %arg1: i32) -> (i32, i32) {
    %c0_i32 = arith.constant 0 : i32
    %c0_i32_0 = arith.constant 0 : i32
    return %c0_i32, %arg1 : i32, i32
  }
  func.func @transform_6(%arg0: i32, %arg1: i32) -> (i32, i32) {
    %c0_i32 = arith.constant 0 : i32
    %c0_i32_0 = arith.constant 0 : i32
    return %c0_i32, %arg1 : i32, i32
  }
  func.func @transform_7(%arg0: i32, %arg1: i32) -> (i32, i32) {
    %c0_i32 = arith.constant 0 : i32
    return %arg0, %arg1 : i32, i32
  }
}

module attributes {stable_mosaic.version = 11 : i64} {
  func.func @kernel(%arg0: i32, %arg1: i32, %arg2: memref<16x128xbf16, #tpu.memory_space<vmem>>, %arg3: memref<128x128xbf16, #tpu.memory_space<vmem>>, %arg4: memref<1x128xf32, #tpu.memory_space<vmem>>, %arg5: memref<1x128xf32, #tpu.memory_space<vmem>>, %arg6: memref<1x128xf32, #tpu.memory_space<vmem>>, %arg7: memref<128x512xbf16, #tpu.memory_space<vmem>>, %arg8: memref<1x512xf32, #tpu.memory_space<vmem>>, %arg9: memref<16x512xbf16, #tpu.memory_space<vmem>>, %arg10: memref<16x128xbf16, #tpu.memory_space<vmem>>) attributes {dimension_semantics = [#tpu.dimension_semantics<parallel>, #tpu.dimension_semantics<arbitrary>], iteration_bounds = array<i64: 2, 1>, scalar_prefetch = 0 : i64, scratch_operands = 1 : i64, tpu.core_type = #tpu.core_type<tc>, window_params = [{transform_indices = @transform_0, window_bounds = array<i64: 16, 128>}, {pipeline_mode = #tpu.pipeline_mode<synchronous>, transform_indices = @transform_1, window_bounds = array<i64: 128, 128>}, {pipeline_mode = #tpu.pipeline_mode<synchronous>, transform_indices = @transform_2, window_bounds = array<i64: 1, 128>}, {pipeline_mode = #tpu.pipeline_mode<synchronous>, transform_indices = @transform_3, window_bounds = array<i64: 1, 128>}, {pipeline_mode = #tpu.pipeline_mode<synchronous>, transform_indices = @transform_4, window_bounds = array<i64: 1, 128>}, {transform_indices = @transform_5, window_bounds = array<i64: 128, 512>}, {transform_indices = @transform_6, window_bounds = array<i64: 1, 512>}, {transform_indices = @transform_7, window_bounds = array<i64: 16, 512>}]} {
    %c0_i32 = arith.constant 0 : i32
    %0 = arith.cmpi eq, %arg1, %c0_i32 : i32
    %1 = arith.extui %0 : i1 to i32
    %c0_i32_0 = arith.constant 0 : i32
    %2 = arith.cmpi ne, %1, %c0_i32_0 : i32
    scf.if %2 {
      %c0_8 = arith.constant 0 : index
      %c0_9 = arith.constant 0 : index
      %11 = vector.load %arg2[%c0_8, %c0_9] : memref<16x128xbf16, #tpu.memory_space<vmem>>, vector<16x128xbf16>
      %c0_10 = arith.constant 0 : index
      %c0_11 = arith.constant 0 : index
      %12 = vector.load %arg3[%c0_10, %c0_11] : memref<128x128xbf16, #tpu.memory_space<vmem>>, vector<128x128xbf16>
      %cst_12 = arith.constant dense<0.000000e+00> : vector<16x128xf32>
      %13 = tpu.matmul %11, %12, %cst_12 {dimension_numbers = #tpu.dot_dimension_numbers<[1], [0], [0], [1], [0, 0, 1, 1], [], []>} : vector<16x128xbf16>, vector<128x128xbf16>, vector<16x128xf32> -> vector<16x128xf32>
      %c0_13 = arith.constant 0 : index
      %c0_14 = arith.constant 0 : index
      %14 = vector.load %arg4[%c0_13, %c0_14] : memref<1x128xf32, #tpu.memory_space<vmem>>, vector<1x128xf32>
      %15 = vector.broadcast %14 : vector<1x128xf32> to vector<16x128xf32>
      %16 = arith.addf %13, %15 : vector<16x128xf32>
      %cst_15 = arith.constant 5.000000e-01 : f32
      %17 = vector.broadcast %cst_15 : f32 to vector<16x128xf32>
      %18 = arith.mulf %16, %17 : vector<16x128xf32>
      %cst_16 = arith.constant 0.707106769 : f32
      %19 = vector.broadcast %cst_16 : f32 to vector<16x128xf32>
      %20 = arith.mulf %16, %19 : vector<16x128xf32>
      %21 = math.erf %20 : vector<16x128xf32>
      %cst_17 = arith.constant 1.000000e+00 : f32
      %22 = vector.broadcast %cst_17 : f32 to vector<16x128xf32>
      %23 = arith.addf %22, %21 : vector<16x128xf32>
      %24 = arith.mulf %18, %23 : vector<16x128xf32>
      %cst_18 = arith.constant dense<0.000000e+00> : vector<16xf32>
      %25 = vector.multi_reduction <add>, %24, %cst_18 [1] : vector<16x128xf32> to vector<16xf32>
      %26 = vector.shape_cast %25 : vector<16xf32> to vector<16x1xf32>
      %cst_19 = arith.constant 1.280000e+02 : f32
      %27 = vector.broadcast %cst_19 : f32 to vector<16x1xf32>
      %28 = arith.divf %26, %27 : vector<16x1xf32>
      %29 = vector.broadcast %28 : vector<16x1xf32> to vector<16x128xf32>
      %30 = arith.subf %24, %29 : vector<16x128xf32>
      %31 = arith.mulf %30, %30 : vector<16x128xf32>
      %cst_20 = arith.constant dense<0.000000e+00> : vector<16xf32>
      %32 = vector.multi_reduction <add>, %31, %cst_20 [1] : vector<16x128xf32> to vector<16xf32>
      %33 = vector.shape_cast %32 : vector<16xf32> to vector<16x1xf32>
      %cst_21 = arith.constant 1.280000e+02 : f32
      %34 = vector.broadcast %cst_21 : f32 to vector<16x1xf32>
      %35 = arith.divf %33, %34 : vector<16x1xf32>
      %cst_22 = arith.constant 9.99999974E-6 : f32
      %36 = vector.broadcast %cst_22 : f32 to vector<16x1xf32>
      %37 = arith.addf %35, %36 : vector<16x1xf32>
      %38 = math.rsqrt %37 : vector<16x1xf32>
      %39 = vector.broadcast %38 : vector<16x1xf32> to vector<16x128xf32>
      %40 = arith.mulf %30, %39 : vector<16x128xf32>
      %c0_23 = arith.constant 0 : index
      %c0_24 = arith.constant 0 : index
      %41 = vector.load %arg5[%c0_23, %c0_24] : memref<1x128xf32, #tpu.memory_space<vmem>>, vector<1x128xf32>
      %42 = vector.broadcast %41 : vector<1x128xf32> to vector<16x128xf32>
      %43 = arith.mulf %40, %42 : vector<16x128xf32>
      %c0_25 = arith.constant 0 : index
      %c0_26 = arith.constant 0 : index
      %44 = vector.load %arg6[%c0_25, %c0_26] : memref<1x128xf32, #tpu.memory_space<vmem>>, vector<1x128xf32>
      %45 = vector.broadcast %44 : vector<1x128xf32> to vector<16x128xf32>
      %46 = arith.addf %43, %45 : vector<16x128xf32>
      %47 = arith.truncf %46 : vector<16x128xf32> to vector<16x128xbf16>
      %c0_27 = arith.constant 0 : index
      %c0_28 = arith.constant 0 : index
      %48 = vector.load %arg10[%c0_27, %c0_28] : memref<16x128xbf16, #tpu.memory_space<vmem>>, vector<16x128xbf16>
      tpu.vector_store %arg10[%c0_27, %c0_28], %47 {strides = array<i32>} : memref<16x128xbf16, #tpu.memory_space<vmem>>, vector<16x128xbf16>,
    } else {
    }
    %c0 = arith.constant 0 : index
    %c0_1 = arith.constant 0 : index
    %3 = vector.load %arg10[%c0, %c0_1] : memref<16x128xbf16, #tpu.memory_space<vmem>>, vector<16x128xbf16>
    %c0_2 = arith.constant 0 : index
    %c0_3 = arith.constant 0 : index
    %4 = vector.load %arg7[%c0_2, %c0_3] : memref<128x512xbf16, #tpu.memory_space<vmem>>, vector<128x512xbf16>
    %cst = arith.constant dense<0.000000e+00> : vector<16x512xf32>
    %5 = tpu.matmul %3, %4, %cst {dimension_numbers = #tpu.dot_dimension_numbers<[1], [0], [0], [1], [0, 0, 1, 1], [], []>} : vector<16x128xbf16>, vector<128x512xbf16>, vector<16x512xf32> -> vector<16x512xf32>
    %c0_4 = arith.constant 0 : index
    %c0_5 = arith.constant 0 : index
    %6 = vector.load %arg8[%c0_4, %c0_5] : memref<1x512xf32, #tpu.memory_space<vmem>>, vector<1x512xf32>
    %7 = vector.broadcast %6 : vector<1x512xf32> to vector<16x512xf32>
    %8 = arith.addf %5, %7 : vector<16x512xf32>
    %9 = arith.truncf %8 : vector<16x512xf32> to vector<16x512xbf16>
    %c0_6 = arith.constant 0 : index
    %c0_7 = arith.constant 0 : index
    %10 = vector.load %arg9[%c0_6, %c0_7] : memref<16x512xbf16, #tpu.memory_space<vmem>>, vector<16x512xbf16>
    tpu.vector_store %arg9[%c0_6, %c0_7], %9 {strides = array<i32>} : memref<16x512xbf16, #tpu.memory_space<vmem>>, vector<16x512xbf16>,
    return
  }
  func.func @transform_0(%arg0: i32, %arg1: i32) -> (i32, i32) {
    %c0_i32 = arith.constant 0 : i32
    %c0_i32_0 = arith.constant 0 : i32
    return %arg0, %c0_i32 : i32, i32
  }
  func.func @transform_1(%arg0: i32, %arg1: i32) -> (i32, i32) {
    %c0_i32 = arith.constant 0 : i32
    %c0_i32_0 = arith.constant 0 : i32
    %c0_i32_1 = arith.constant 0 : i32
    return %c0_i32, %c0_i32_0 : i32, i32
  }
  func.func @transform_2(%arg0: i32, %arg1: i32) -> (i32, i32) {
    %c0_i32 = arith.constant 0 : i32
    %c0_i32_0 = arith.constant 0 : i32
    %c0_i32_1 = arith.constant 0 : i32
    return %c0_i32, %c0_i32_0 : i32, i32
  }
  func.func @transform_3(%arg0: i32, %arg1: i32) -> (i32, i32) {
    %c0_i32 = arith.constant 0 : i32
    %c0_i32_0 = arith.constant 0 : i32
    %c0_i32_1 = arith.constant 0 : i32
    return %c0_i32, %c0_i32_0 : i32, i32
  }
  func.func @transform_4(%arg0: i32, %arg1: i32) -> (i32, i32) {
    %c0_i32 = arith.constant 0 : i32
    %c0_i32_0 = arith.constant 0 : i32
    %c0_i32_1 = arith.constant 0 : i32
    return %c0_i32, %c0_i32_0 : i32, i32
  }
  func.func @transform_5(%arg0: i32, %arg1: i32) -> (i32, i32) {
    %c0_i32 = arith.constant 0 : i32
    %c0_i32_0 = arith.constant 0 : i32
    return %c0_i32, %arg1 : i32, i32
  }
  func.func @transform_6(%arg0: i32, %arg1: i32) -> (i32, i32) {
    %c0_i32 = arith.constant 0 : i32
    %c0_i32_0 = arith.constant 0 : i32
    return %c0_i32, %arg1 : i32, i32
  }
  func.func @transform_7(%arg0: i32, %arg1: i32) -> (i32, i32) {
    %c0_i32 = arith.constant 0 : i32
    return %arg0, %arg1 : i32, i32
  }
}

</mosaic_0001>

<bundles_post_ra>
// kernel: tpu_custom_call.1
= control target key start
LH: loop header
LB: loop body
LE: loop exit
PB: predicated region body
PF: predicated region fallthrough
CT: control target
= control target key end

     0   :  { %s1956_s0 = inlined_call_operand.hbm [shape: bf16[32,128], index: 0, kind: input, shape index: {}]   ;;  %s1957_s1 = inlined_call_operand.hbm [shape: bf16[128,128], index: 1, kind: input, shape index: {}]   ;;  %s1958_s2 = inlined_call_operand.vmem [shape: f32[1,128], index: 2, kind: input, shape index: {}]   ;;  %s1959_s3 = inlined_call_operand.hbm [shape: f32[1,128], index: 3, kind: input, shape index: {}]   ;;  %s1960_s4 = inlined_call_operand.hbm [shape: f32[1,128], index: 4, kind: input, shape index: {}]   ;;  %s1961_s5 = inlined_call_operand.hbm [shape: bf16[128,512], index: 5, kind: input, shape index: {}]   ;;  %s1962_s6 = inlined_call_operand.vmem [shape: f32[1,512], index: 6, kind: input, shape index: {}]   ;;  %s1963_s7 = inlined_call_operand.hbm [shape: bf16[32,512], index: 7, kind: output, shape index: {}]  }
   0x1   :  { %1967 = sst [smem:[#allocation17_spill]] %s1957_s1 }
   0x2   :  { %1968 = sst [smem:[#allocation18_spill]] %s1959_s3 }
   0x3   :  { %1969 = sst [smem:[#allocation19_spill]] %s1960_s4 }
   0x4   :  { %1970 = sst [smem:[#allocation20_spill]] %s1961_s5 }
   0x5   :  { %12 = vsyncpa [#allocation4], 0 }
   0x6   :  { %14 = vsyncpa [#allocation4 + $0x1], 0 }
   0x7   :  { %15 = vsyncpa [#allocation7], 0 }
   0x8   :  { %16 = vsyncpa [#allocation10], 0 }
   0x9   :  { %17 = vsyncpa [#allocation5], 0 }
   0xa   :  { %19 = vsyncpa [#allocation5 + $0x1], 0  ;;  %s1741_s24 = smov 0   ;;  %s1743_s25 = smov 0  }
   0xb   :  { %s1745_s26 = smov 0   ;;  %s1747_s27 = smov 0  }
   0xc   :  { %s1749_s28 = smov 0   ;;  %s1751_s29 = smov 0  }
   0xd LB: > { %s1964_s30 = sadd.s32 4294967295, %s1688_s29   ;;  %s1081_s8 = sadd.s32 4294967294, %s1688_s29   ;;  %s1688_s29 = sphi %s1751_s29, %s25_s29   ;;  %s1684_s28 = sphi %s1749_s28, %s1988_s28   ;;  %s1680_s27 = sphi %s1747_s27, %s1987_s27   ;;  %s1676_s26 = sphi %s1745_s26, %s1986_s26   ;;  %s1672_s25 = sphi %s1743_s25, %s1985_s25   ;;  %s1668_s24 = sphi %s1741_s24, %s1984_s24  }
   0xe   : > { %p57_p0 = scmp.ne.s32.totalorder %s1672_s25, %s1668_s24  ;;  %p1777_p1 = scmp.eq.s32.totalorder %s1964_s30, 0 }
   0xf   : > { %p225_p2 = scmp.eq.s32.totalorder %s1081_s8, 1  ;;  %p1082_p4 = scmp.ge.s32.totalorder %s1688_s29, 1 }
  0x10   : > { %p1783_p3 = por %p1777_p1, %p57_p0  ;;  %p232_p6 = scmp.lt.s32.totalorder %s1688_s29, 3 }
  0x11   : > { %p1788_p5 = por %p225_p2, %p57_p0  ;;  %s1974_s1 = sld [smem:[#allocation17_spill]] }
  0x12   : > { %p1796_p7 = pnand %p1082_p4, %p232_p6  ;;  %s1690_s16 = smov [#allocation6]  }
  0x13   : > { %s245_s17 = sshll.u32 %s1690_s16, 4  ;;  %p1088_p10 = scmp.ge.s32.totalorder %s1688_s29, 2  ;;  %s246_s17 = int_to_ptr.vmem [resolvable:$true] %s245_s17 }
  0x14   : > { %p1345_p8 = pneg %p1796_p7  ;;  %s1977_s4 = sld [smem:[#allocation19_spill]] }
  0x15   : > { %s1965_s22 = smov 64   ;;  %s1966_s23 = smov 4  }
  0x16   : > { %p1804_p9 = pnand %p1345_p8, %p1777_p1  ;;  %s1693_s8 = smov [#allocation9]  }
  0x17   : > { %s243_s14 = sshll.u32 %s1974_s1, 4  ;;  %s275_s12 = sshll.u32 %s1693_s8, 4  ;;  %s244_s14 = int_to_ptr.hbm [resolvable:$true] %s243_s14  ;;  %s276_s12 = int_to_ptr.vmem [resolvable:$true] %s275_s12 }
  0x18   : > { %1348 = dma.hbm_to_vmem [thread:$0]  (!%p1804_p9), %s244_s14, 1024, %s246_s17, [#allocation7], %s1965_s22, %s1965_s22, %s1966_s23  }
  0x19   : > { %s1978_s3 = sld [smem:[#allocation18_spill]]  ;;  %s1694_s14 = smov [#allocation8]  }
  0x1a   : > { %s273_s21 = sshll.u32 %s1977_s4, 4  ;;  %s1979_s5 = sld [smem:[#allocation20_spill]]  ;;  %s274_s21 = int_to_ptr.hbm [resolvable:$true] %s273_s21 }
  0x1b   : > { %1354 = dma.hbm_to_vmem [thread:$0]  (!%p1804_p9), %s274_s21, 16, %s276_s12, [#allocation10]  }
  0x1c   : > { %s263_s17 = sshll.u32 %s1694_s14, 4  ;;  %s1695_s8 = smov [#allocation11]   ;;  %s264_s17 = int_to_ptr.vmem [resolvable:$true] %s263_s17 }
  0x1d   : > { %s289_s13 = sshll.u32 %s1695_s8, 4  ;;  %s1696_s21 = smov 256   ;;  %s290_s13 = int_to_ptr.vmem [resolvable:$true] %s289_s13 }
  0x1e   : > { %s1697_s12 = smov 16   ;;  %s1980_s16 = sadd.s32 4294967295, %s1688_s29  }
  0x1f   : > { %s261_s30 = sshll.u32 %s1978_s3, 4  ;;  %p219_p11 = scmp.eq.s32.totalorder %s1980_s16, 1  ;;  %s262_s30 = int_to_ptr.hbm [resolvable:$true] %s261_s30 }
  0x20   : > { %s287_s1 = sshll.u32 %s1979_s5, 4  ;;  %s37_s19 = sadd.s32 1, %s1684_s28  ;;  %s288_s1 = int_to_ptr.hbm [resolvable:$true] %s287_s1 }
  0x21   : > { %1351 = dma.hbm_to_vmem [thread:$0]  (!%p1804_p9), %s262_s30, 16, %s264_s17, [#allocation7]  }
  0x22   : > { %1357 = dma.hbm_to_vmem [thread:$0]  (!%p1804_p9), %s288_s1, 4096, %s290_s13, [#allocation10], %s1696_s21, %s1696_s21, %s1697_s12  }
  0x23   : > { %p39_p12 = scmp.ge.s32.totalorder %s37_s19, 2  ;;  %s44_s20 = sadd.s32 1, %s1676_s26 }
  0x24   : > { %p51_p13 = scmp.ne.s32.totalorder %s1676_s26, %s1672_s25  ;;  %p52_p0 = scmp.eq.s32.totalorder %s1688_s29, 0 }
  0x25   : > { %s1990_s19 = smov (%p39_p12, %s37_s19), 0  ;;  %p1370_p4 = scmp.lt.s32.totalorder %s1688_s29, 2 }
  0x26   : > { %p1838_p2 = por %p219_p11, %p51_p13  ;;  %s41_s18 = ssub.s32 %s1684_s28, %s1990_s19 }
  0x27   : > { %s311_s14 = sand.u32 1, %s1676_s26   ;;  %p42_p6 = scmp.eq.s32.totalorder %s41_s18, 0 }
  0x28   : > { %p53_p8 = por %p52_p0, %p51_p13  ;;  %s1089_s1 = sshll.u32 %s311_s14, 3 }
  0x29   : > { %s1275_s17 = sshll.u32 %s1684_s28, 3  ;;  %s315_s22 = scalar_lea.vmem [#allocation3], %s1089_s1 }
  0x2a   : > { %s1848_s8 = scalar_select %p42_p6, %s1676_s26, %s44_s20  }
  0x2b   : > { %s320_s12 = scalar_lea.hbm %s1956_s0, %s1275_s17  ;;  %s323_s23 = sshll.u32 %s315_s22, 4  ;;  %s324_s23 = int_to_ptr.vmem [resolvable:$true] %s323_s23 }
  0x2c   : > { %s321_s16 = sshll.u32 %s320_s12, 4  ;;  %p1359_p9 = pnand %p1370_p4, %p53_p8  ;;  %s322_s16 = int_to_ptr.hbm [resolvable:$true] %s321_s16 }
  0x2d   : > { %s312_s3 = scalar_lea.sflag [#allocation4], %s311_s14  ;;  %s1982_s4 = smov 4  }
  0x2e   : > { %s1983_s5 = smov 64   ;;  %335 = sbr.rel (%p1796_p7) target bundleno = 700 (0x2bc), region = 48 }
  0x2f   : > { %1361 = dma.hbm_to_vmem [thread:$0]  (!%p1359_p9), %s322_s16, 128, %s324_s23, %s312_s3, %s1983_s5, %s1983_s5, %s1982_s4  }
  0x30   : > { %s1861_s20 = sand.u32 (!%p1796_p7), 1, %s1672_s25  }
  0x31   : > { %s1093_s18 = sshll.u32 (!%p1796_p7), %s1861_s20, 3  ;;  %s338_s22 = scalar_lea.sflag (!%p1796_p7), [#allocation4], %s1861_s20 }
  0x32   : > { %s341_s1 = scalar_lea.vmem (!%p1796_p7), [#allocation3], %s1093_s18 }
  0x33   : > { %1651 = dma.done.wait (%p1783_p3), %s338_s22, 128  }
  0x34   : > { %1653 = vsyncadd (%p1783_p3), %s338_s22, 4294967168 }
  0x35   : > { %1655 = dma.done.wait (%p1777_p1), [#allocation7], 1040  }
  0x36   : > { %1657 = vsyncadd (%p1777_p1), [#allocation7], 4294966256 }
  0x37   : > { %1659 = dma.done.wait (%p1777_p1), [#allocation10], 4112  }
  0x38   : > { %1661 = vsyncadd (%p1777_p1), [#allocation10], 4294963184  ;;  %v1284_v0 = vld [vmem:[#allocation6 + $0x38] sm:$0xff]  ;;  %v1283_v1 = vld [vmem:[#allocation6 + $0x30] sm:$0xff]  ;;  %s1098_s10 = sshll.u32 %s1861_s20, 5  ;;  %s1319_s15 = sshll.u32 %s1680_s27, 5 }
  0x39   : > { %486 = vmatpush.bf16.msra.mxu0 %v1284_v0  ;;  %v1282_v2 = vld [vmem:[#allocation6 + $0x28] sm:$0xff]  ;;  %v1281_v3 = vld [vmem:[#allocation6 + $0x20] sm:$0xff]  ;;  %v1280_v4 = vld [vmem:[#allocation6 + $0x18] sm:$0xff]  ;;  %s396_s23 = scalar_lea.vmem [#allocation12], %s1098_s10  ;;  %s940_s13 = scalar_lea.hbm %s1963_s7, %s1319_s15 }
  0x3a   : > { %v1279_v5 = vld [vmem:[#allocation6 + $0x10] sm:$0xff]  ;;  %v1278_v6 = vld [vmem:[#allocation6 + $0x8] sm:$0xff]  ;;  %v1277_v7 = vld [vmem:[#allocation6] sm:$0xff]  ;;  %s941_s21 = sshll.u32 %s396_s23, 4  ;;  %s943_s12 = sshll.u32 %s940_s13, 4  ;;  %s942_s21 = int_to_ptr.vmem [resolvable:$true] %s941_s21  ;;  %s944_s12 = int_to_ptr.hbm [resolvable:$true] %s943_s12 }
  0x3b   : > { %v1276_v8 = vld [vmem:[%s341_s1] sm:$0xff]  ;;  %v1435_v9 = vld [vmem:[%s1958_s2] ss:$0 sm:$0xff]  ;;  %s926_s27 = scalar_lea.sflag [#allocation5], %s1861_s20  ;;  %s1612_s16 = sshra.s32 %s944_s12, 4  ;;  %s1613_s16 = int_to_ptr.hbm [resolvable:$true] %s1612_s16 }
  0x3c   : > { %s1614_s18 = scalar_lea.hbm %s1613_s16, 32  ;;  %s1618_s3 = scalar_lea.hbm %s1963_s7, 64 }
  0x3d   : > { %487 = vmatpush.bf16.msra.mxu0 %v1283_v1  ;;  %p1615_p1 = scmp.ne.s32.totalorder %s1613_s16, %s1614_s18  ;;  %p1619_p11 = scmp.lt.s32.totalorder %s1613_s16, %s1963_s7 }
  0x3e   : > { %p1620_p12 = scmp.lt.s32.totalorder %s1618_s3, %s1614_s18 }
  0x3f   : > { %p1616_p3 = pnand %p1615_p1, %p1838_p2 }
  0x40   : > { %p1621_p13 = por %p1620_p12, %p1619_p11 }
  0x41   : > { %488 = vmatpush.bf16.msra.mxu0 %v1282_v2  ;;  %p1617_p7 = pneg %p1616_p3 }
  0x43   : > { %p1622_p0 = pnand %p1621_p13, %p1617_p7 }
  0x45   : > { %489 = vmatpush.bf16.msra.mxu0 %v1281_v3 }
  0x49   : > { %490 = vmatpush.bf16.msra.mxu0 %v1280_v4 }
  0x4d   : > { %491 = vmatpush.bf16.msra.mxu0 %v1279_v5 }
  0x51   : > { %492 = vmatpush.bf16.msra.mxu0 %v1278_v6 }
  0x55   : > { %493 = vmatpush.bf16.msra.mxu0 %v1277_v7 }
  0x58   : > { %494 = vmatmul.bf16.vlgmr.msra.gmra.mxu0 %v1276_v8 }
  0xd5   : > { %v495_v10 = vpop.f32.mrf.mxu0 }
  0xd6   : > { %v1880_v11 = vadd.f32 %v1435_v9, %v495_v10 }
  0xd8   : > { %v502_v12 = vmul.f32 0.70710677, %v1880_v11 }
  0xda   : > { %v504_v13 = vmul.f32 %v502_v12, %v502_v12 }
  0xdc   : > { %v505_v14 = vmin.f32 %v504_v13, 16.0 }
  0xdd   : > { %v497_v15 = vpop.f32.mrf.mxu0 }
  0xde   : > { %v506_v16 = vmul.f32 2.1237322e-06, %v505_v14  ;;  %v1883_v17 = vadd.f32 %v1435_v9, %v497_v15  ;;  %v517_v18 = vmul.f32 3.8918573e-05, %v505_v14 }
  0xe0   : > { %v507_v19 = vadd.f32 0.00028619796, %v506_v16  ;;  %v1886_v20 = vmul.f32 0.70710677, %v1883_v17  ;;  %v518_v21 = vadd.f32 0.001143296, %v517_v18 }
  0xe2   : > { %v508_v22 = vmul.f32 %v507_v19, %v505_v14  ;;  %v544_v23 = vmul.f32 %v1886_v20, %v1886_v20  ;;  %v519_v24 = vmul.f32 %v518_v21, %v505_v14  ;;  %v500_v19 = vmul.f32 0.5, %v1880_v11 }
  0xe4   : > { %v545_v25 = vmin.f32 %v544_v23, 16.0  ;;  %v520_v26 = vadd.f32 0.014752088, %v519_v24  ;;  %v509_v27 = vadd.f32 0.0036580483, %v508_v22 }
  0xe6   : > { %v546_v28 = vmul.f32 2.1237322e-06, %v545_v25  ;;  %v557_v29 = vmul.f32 3.8918573e-05, %v545_v25  ;;  %v521_v30 = vmul.f32 %v520_v26, %v505_v14  ;;  %v510_v34 = vmul.f32 %v509_v27, %v505_v14 }
  0xe8   : > { %v547_v31 = vadd.f32 0.00028619796, %v546_v28  ;;  %v558_v32 = vadd.f32 0.001143296, %v557_v29  ;;  %v522_v33 = vadd.f32 0.112945676, %v521_v30 }
  0xe9   : > { %v511_v41 = vadd.f32 0.05243302, %v510_v34  ;;  %v501_v28 = vmul.f32 0.5, %v1883_v17 }
  0xea   : > { %v548_v35 = vmul.f32 %v547_v31, %v545_v25  ;;  %v559_v36 = vmul.f32 %v558_v32, %v545_v25  ;;  %v523_v37 = vmul.f32 %v522_v33, %v505_v14  ;;  %v1698_v31 = vmov 128.0  }
  0xeb   : > { %v512_v47 = vmul.f32 %v511_v41, %v505_v14 }
  0xec   : > { %v560_v38 = vadd.f32 0.014752088, %v559_v36  ;;  %v549_v39 = vadd.f32 0.0036580483, %v548_v35  ;;  %v524_v40 = vadd.f32 0.4994258, %v523_v37 }
  0xed   : > { %v513_v51 = vadd.f32 0.18741608, %v512_v47  ;;  %v1257_v47 = vld [vmem:[#allocation11 + $0xf0] sm:$0xf0] }
  0xee   : > { %v561_v42 = vmul.f32 %v560_v38, %v545_v25  ;;  %v525_v43 = vmul.f32 %v524_v40, %v505_v14  ;;  %v550_v45 = vmul.f32 %v549_v39, %v545_v25 }
  0xef   : > { %v514_v56 = vmul.f32 %v513_v51, %v505_v14 }
  0xf0   : > { %v562_v44 = vadd.f32 0.112945676, %v561_v42  ;;  %v526_v46 = vadd.f32 1.0, %v525_v43  ;;  %v551_v50 = vadd.f32 0.05243302, %v550_v45 }
  0xf1   : > { %v515_v61 = vadd.f32 1.1283791, %v514_v56  ;;  %v1255_v43 = vld [vmem:[#allocation11 + $0xe0] sm:$0xf]  ;;  %v1314_v45 = vld [vmem:[#allocation11 + $0xe4] sm:$0xf] }
  0xf2   : > { %v563_v48 = vmul.f32 %v562_v44, %v545_v25  ;;  %1438 = vrcp.f32 %v526_v46  ;;  %v552_v55 = vmul.f32 %v551_v50, %v545_v25  ;;  %v538_v60 = vand.u32 2147483648, %v526_v46  ;;  %v1316_v44 = vld [vmem:[#allocation11 + $0xec] sm:$0xf0] }
  0xf3   : > { %v536_v63 = vand.u32 2147483647, %v526_v46  ;;  %vm532_vm1 = vweird.f32 %v526_v46  ;;  %v516_v5 = vmul.f32 %v515_v61, %v502_v12  ;;  %v1260_v50 = vor.u32 %v1314_v45, %v1257_v47  ;;  %v1312_v56 = vld [vmem:[#allocation11 + $0xcc] sm:$0xf0]  ;;  %v1313_v61 = vld [vmem:[#allocation11 + $0xd4] sm:$0xf0] }
  0xf4   : > { %v564_v49 = vadd.f32 0.4994258, %v563_v48  ;;  %v553_v59 = vadd.f32 0.18741608, %v552_v55  ;;  %v539_v3 = vor.u32 1.1754944e-38, %v538_v60 }
  0xf5   : > { %vm537_vm3 = vcmp.eq.f32.partialorder %v536_v63, 8.507059e+37  ;;  %v1263_v48 = vld [vmem:[#allocation11 + $0xe8] sm:$0xf]  ;;  %875 = vmatpush.bf16.msra.mxu2 %v1260_v50  ;;  %v1239_v55 = vld [vmem:[#allocation11 + $0xc0] sm:$0xf] }
  0xf6   : > { %v565_v52 = vmul.f32 %v564_v49, %v545_v25  ;;  %v554_v2 = vmul.f32 %v553_v59, %v545_v25  ;;  %v1317_v49 = vld [vmem:[#allocation11 + $0xf4] sm:$0xf0]  ;;  %v1241_v59 = vld [vmem:[#allocation11 + $0xd0] sm:$0xf0]  ;;  %v1247_v60 = vld [vmem:[#allocation11 + $0xc8] sm:$0xf] }
  0xf7   : > { %v1264_v51 = vor.u32 %v1317_v49, %v1263_v48  ;;  %v1248_v63 = vor.u32 %v1313_v61, %v1247_v60  ;;  %v1296_v45 = vld [vmem:[#allocation11 + $0x4c] sm:$0xf0]  ;;  %v1177_v49 = vld [vmem:[#allocation11 + $0x50] sm:$0xf0]  ;;  %v1183_v50 = vld [vmem:[#allocation11 + $0x48] sm:$0xf] }
  0xf8   : > { %v566_v53 = vadd.f32 1.0, %v565_v52  ;;  %v1439_v54 = vpop.eup %1438  ;;  %v555_v13 = vadd.f32 1.1283791, %v554_v2  ;;  %v1315_v52 = vld [vmem:[#allocation11 + $0xec] sm:$0xf] }
  0xf9   : > { %v528_v57 = vmul.f32 %v1439_v54, %v526_v46  ;;  %vm533_vm0 = vweird.f32 %v1439_v54  ;;  %v1256_v46 = vor.u32 %v1316_v44, %v1255_v43  ;;  %889 = vmatpush.bf16.msra.mxu3 %v1264_v51  ;;  %v1175_v44 = vld [vmem:[#allocation11 + $0x40] sm:$0xf]  ;;  %v1161_v61 = vld [vmem:[#allocation11 + $0x30] sm:$0xf0] }
  0xfa   : > { %1440 = vrcp.f32 %v566_v53  ;;  %vm534_vm2 = vmor %vm532_vm1, %vm533_vm0  ;;  %v578_v10 = vand.u32 2147483648, %v566_v53  ;;  %v576_v15 = vand.u32 2147483647, %v566_v53  ;;  %vm572_vm5 = vweird.f32 %v566_v53 }
  0xfb   : > { %v529_v58 = vsub.f32 1.0, %v528_v57  ;;  %v556_v12 = vmul.f32 %v555_v13, %v1886_v20  ;;  %1442 = vrcp.f32 %v1698_v31  ;;  %861 = vmatpush.bf16.msra.mxu1 %v1256_v46  ;;  %v1310_v57 = vld [vmem:[#allocation11 + $0xc4] sm:$0xf]  ;;  %v1300_v31 = vld [vmem:[#allocation11 + $0x6c] sm:$0xf0]  ;;  %v1176_v48 = vor.u32 %v1296_v45, %v1175_v44 }
  0xfc   : > { %v579_v22 = vor.u32 1.1754944e-38, %v578_v10  ;;  %vm577_vm7 = vcmp.eq.f32.partialorder %v576_v15, 8.507059e+37  ;;  %v1233_v15 = vld [vmem:[#allocation11 + $0xb8] sm:$0xf0]  ;;  %v1294_v46 = vld [vmem:[#allocation11 + $0x44] sm:$0xf] }
  0xfd   : > { %v530_v62 = vmul.f32 %v1439_v54, %v529_v58  ;;  %v1240_v58 = vor.u32 %v1312_v56, %v1239_v55  ;;  %890 = vmatpush.bf16.msra.mxu3 %v1248_v63  ;;  %v1180_v51 = vor.u32 %v1294_v46, %v1177_v49  ;;  %v1293_v63 = vld [vmem:[#allocation11 + $0x34] sm:$0xf0] }
  0xff   : > { %v531_v1 = vadd.f32 %v1439_v54, %v530_v62  ;;  %v1244_v62 = vor.u32 %v1310_v57, %v1241_v59  ;;  %862 = vmatpush.bf16.msra.mxu1 %v1240_v58  ;;  %v1159_v57 = vld [vmem:[#allocation11 + $0x20] sm:$0xf]  ;;  %v1292_v58 = vld [vmem:[#allocation11 + $0x2c] sm:$0xf0]  ;;  %v1290_v59 = vld [vmem:[#allocation11 + $0x24] sm:$0xf] }
 0x100   : > { %v1441_v0 = vpop.eup %1440  ;;  %v1160_v60 = vor.u32 %v1292_v58, %v1159_v57 }
 0x101   : > { %v568_v4 = vmul.f32 %v1441_v0, %v566_v53  ;;  %v535_v6 = vsel %vm534_vm2, %v1439_v54, %v531_v1  ;;  %vm573_vm4 = vweird.f32 %v1441_v0  ;;  %v1443_v11 = vpop.eup %1442  ;;  %v1265_v53 = vld [vmem:[#allocation11 + $0xf8] sm:$0xf0]  ;;  %876 = vmatpush.bf16.msra.mxu2 %v1244_v62  ;;  %v1167_v62 = vld [vmem:[#allocation11 + $0x28] sm:$0xf] }
 0x102   : > { %v540_v7 = vsel %vm537_vm3, %v539_v3, %v535_v6  ;;  %vm574_vm6 = vmor %vm572_vm5, %vm573_vm4  ;;  %v593_v32 = vmul.f32 128.0, %v1443_v11  ;;  %vm597_vm8 = vweird.f32 %v1443_v11  ;;  %v1268_v54 = vor.u32 %v1315_v52, %v1265_v53  ;;  %v1249_v1 = vld [vmem:[#allocation11 + $0xd8] sm:$0xf0]  ;;  %v1223_v3 = vld [vmem:[#allocation11 + $0xa0] sm:$0xf] }
 0x103   : > { %v569_v8 = vsub.f32 1.0, %v568_v4  ;;  %v541_v9 = vmul.f32 %v540_v7, %v516_v5  ;;  %v1308_v4 = vld [vmem:[#allocation11 + $0xac] sm:$0xf0]  ;;  %v1306_v5 = vld [vmem:[#allocation11 + $0xa4] sm:$0xf] }
 0x104   : > { %v594_v33 = vsub.f32 1.0, %v593_v32  ;;  %903 = vmatpush.bf16.msrb.mxu0 %v1268_v54  ;;  %v1224_v6 = vor.u32 %v1308_v4, %v1223_v3  ;;  %v1225_v7 = vld [vmem:[#allocation11 + $0xb0] sm:$0xf0]  ;;  %v1297_v52 = vld [vmem:[#allocation11 + $0x54] sm:$0xf0] }
 0x105   : > { %v570_v14 = vmul.f32 %v1441_v0, %v569_v8  ;;  %v1135_v16 = vclamps-f32 %v541_v9, 1.0  ;;  %v1231_v8 = vld [vmem:[#allocation11 + $0xa8] sm:$0xf]  ;;  %v1309_v9 = vld [vmem:[#allocation11 + $0xb4] sm:$0xf0]  ;;  %v1228_v10 = vor.u32 %v1306_v5, %v1225_v7  ;;  %v1184_v55 = vor.u32 %v1297_v52, %v1183_v50 }
 0x106   : > { %v595_v34 = vmul.f32 %v1443_v11, %v594_v33  ;;  %v1232_v13 = vor.u32 %v1309_v9, %v1231_v8  ;;  %863 = vmatpush.bf16.msra.mxu1 %v1224_v6  ;;  %v1193_v33 = vld [vmem:[#allocation11 + $0x70] sm:$0xf0]  ;;  %v1295_v53 = vld [vmem:[#allocation11 + $0x4c] sm:$0xf]  ;;  %v1185_v54 = vld [vmem:[#allocation11 + $0x58] sm:$0xf0] }
 0x107   : > { %v571_v18 = vadd.f32 %v1441_v0, %v570_v14  ;;  %v584_v21 = vadd.f32 1.0, %v1135_v16  ;;  %v1307_v14 = vld [vmem:[#allocation11 + $0xac] sm:$0xf]  ;;  %877 = vmatpush.bf16.msra.mxu2 %v1228_v10  ;;  %v1188_v56 = vor.u32 %v1295_v53, %v1185_v54  ;;  %v1169_v4 = vld [vmem:[#allocation11 + $0x38] sm:$0xf0] }
 0x108   : > { %v596_v35 = vadd.f32 %v1443_v11, %v595_v34  ;;  %v1236_v16 = vor.u32 %v1307_v14, %v1233_v15  ;;  %891 = vmatpush.bf16.msra.mxu3 %v1232_v13  ;;  %v1199_v34 = vld [vmem:[#allocation11 + $0x68] sm:$0xf]  ;;  %v1291_v3 = vld [vmem:[#allocation11 + $0x2c] sm:$0xf]  ;;  %v1143_v5 = vld [vmem:[#allocation11] sm:$0xf] }
 0x109   : > { %v575_v23 = vsel %vm574_vm6, %v1441_v0, %v571_v18  ;;  %v586_v24 = vmul.f32 %v584_v21, %v500_v19  ;;  %v1311_v0 = vld [vmem:[#allocation11 + $0xcc] sm:$0xf]  ;;  %v1207_v18 = vld [vmem:[#allocation11 + $0x80] sm:$0xf]  ;;  %v1304_v19 = vld [vmem:[#allocation11 + $0x8c] sm:$0xf0]  ;;  %v1172_v7 = vor.u32 %v1291_v3, %v1169_v4 }
 0x10a   : > { %v580_v25 = vsel %vm577_vm7, %v579_v22, %v575_v23  ;;  %v1893_v20 = vsel %vm597_vm8, %v1443_v11, %v596_v35  ;;  %v1252_v2 = vor.u32 %v1311_v0, %v1249_v1  ;;  %v1302_v21 = vld [vmem:[#allocation11 + $0x84] sm:$0xf]  ;;  %v1208_v22 = vor.u32 %v1304_v19, %v1207_v18  ;;  %v1215_v23 = vld [vmem:[#allocation11 + $0x88] sm:$0xf]  ;;  %v1301_v35 = vld [vmem:[#allocation11 + $0x74] sm:$0xf0] }
 0x10b   : > { %v581_v26 = vmul.f32 %v580_v25, %v556_v12  ;;  %588 = vadd.xlane.f32.xlu0 %v586_v24  ;;  %v1209_v12 = vld [vmem:[#allocation11 + $0x90] sm:$0xf0]  ;;  %v1298_v11 = vld [vmem:[#allocation11 + $0x64] sm:$0xf]  ;;  %v1164_v1 = vor.u32 %v1290_v59, %v1161_v61  ;;  %v1288_v8 = vld [vmem:[#allocation11 + $0xc] sm:$0xf0] }
 0x10c   : > { %904 = vmatpush.bf16.msrb.mxu0 %v1252_v2  ;;  %v1212_v25 = vor.u32 %v1302_v21, %v1209_v12  ;;  %864 = vmatpush.bf16.msra.mxu1 %v1208_v22  ;;  %v1168_v2 = vor.u32 %v1293_v63, %v1167_v62  ;;  %v1286_v9 = vld [vmem:[#allocation11 + $0x4] sm:$0xf]  ;;  %v1145_v10 = vld [vmem:[#allocation11 + $0x10] sm:$0xf0]  ;;  %v1144_v13 = vor.u32 %v1288_v8, %v1143_v5  ;;  %v1151_v15 = vld [vmem:[#allocation11 + $0x8] sm:$0xf] }
 0x10d   : > { %v1136_v27 = vclamps-f32 %v581_v26, 1.0  ;;  %v1148_v14 = vor.u32 %v1286_v9, %v1145_v10  ;;  %v1287_v18 = vld [vmem:[#allocation11 + $0xc] sm:$0xf]  ;;  %v1153_v12 = vld [vmem:[#allocation11 + $0x18] sm:$0xf0] }
 0x10e   : > { %878 = vmatpush.bf16.msra.mxu2 %v1212_v25 }
 0x10f   : > { %v585_v29 = vadd.f32 1.0, %v1136_v27  ;;  %v1303_v27 = vld [vmem:[#allocation11 + $0x8c] sm:$0xf] }
 0x110   : > { %905 = vmatpush.bf16.msrb.mxu0 %v1236_v16  ;;  %v1289_v16 = vld [vmem:[#allocation11 + $0x14] sm:$0xf0] }
 0x111   : > { %v587_v30 = vmul.f32 %v585_v29, %v501_v28  ;;  %v1217_v28 = vld [vmem:[#allocation11 + $0x98] sm:$0xf0]  ;;  %v1152_v22 = vor.u32 %v1289_v16, %v1151_v15 }
 0x112   : > { %v1220_v29 = vor.u32 %v1303_v27, %v1217_v28 }
 0x113   : > { %590 = vadd.xlane.f32.xlu0 %v587_v30 }
 0x114   : > { %906 = vmatpush.bf16.msrb.mxu0 %v1220_v29 }
 0x17e   : > { %v589_v36 = vpop.xlane.xlu0 %588 }
 0x17f   : > { %v599_v37 = vmul.f32 %v1893_v20, %v589_v36 }
 0x181   : > { %v1896_v38 = vsub.f32 %v586_v24, %v599_v37  ;;  %v1305_v24 = vld [vmem:[#allocation11 + $0x94] sm:$0xf0]  ;;  %v1196_v37 = vor.u32 %v1298_v11, %v1193_v33  ;;  %v1436_v33 = vld [vmem:[#allocation8] ss:$0 sm:$0xff] }
 0x182   : > { %v1216_v26 = vor.u32 %v1305_v24, %v1215_v23 }
 0x183   : > { %v603_v17 = vmul.f32 %v1896_v38, %v1896_v38  ;;  %879 = vmatpush.bf16.msra.mxu2 %v1196_v37  ;;  %v1437_v37 = vld [vmem:[#allocation9] ss:$0 sm:$0xff] }
 0x184   : > { %892 = vmatpush.bf16.msra.mxu3 %v1216_v26 }
 0x185   : > { %605 = vadd.xlane.f32.xlu1 %v603_v17  ;;  %v1200_v17 = vor.u32 %v1301_v35, %v1199_v34 }
 0x186   : > { %v591_v39 = vpop.xlane.xlu0 %590 }
 0x187   : > { %v600_v40 = vmul.f32 %v1893_v20, %v591_v39  ;;  %v1299_v39 = vld [vmem:[#allocation11 + $0x6c] sm:$0xf]  ;;  %880 = vmatpush.bf16.msra.mxu2 %v1180_v51 }
 0x188   : > { %893 = vmatpush.bf16.msra.mxu3 %v1200_v17 }
 0x189   : > { %v1901_v41 = vsub.f32 %v587_v30, %v600_v40  ;;  %v1191_v30 = vld [vmem:[#allocation11 + $0x60] sm:$0xf]  ;;  %v1201_v40 = vld [vmem:[#allocation11 + $0x78] sm:$0xf0] }
 0x18a   : > { %v1192_v32 = vor.u32 %v1300_v31, %v1191_v30  ;;  %v1204_v43 = vor.u32 %v1299_v39, %v1201_v40 }
 0x18b   : > { %v604_v42 = vmul.f32 %v1901_v41, %v1901_v41  ;;  %881 = vmatpush.bf16.msra.mxu2 %v1164_v1 }
 0x18c   : > { %865 = vmatpush.bf16.msra.mxu1 %v1192_v32  ;;  %907 = vmatpush.bf16.msrb.mxu0 %v1204_v43 }
 0x18d   : > { %607 = vadd.xlane.f32.xlu1 %v604_v42  ;;  %894 = vmatpush.bf16.msra.mxu3 %v1184_v55 }
 0x18f   : > { %882 = vmatpush.bf16.msra.mxu2 %v1148_v14 }
 0x190   : > { %866 = vmatpush.bf16.msra.mxu1 %v1176_v48  ;;  %908 = vmatpush.bf16.msrb.mxu0 %v1188_v56 }
 0x191   : > { %895 = vmatpush.bf16.msra.mxu3 %v1168_v2 }
 0x194   : > { %867 = vmatpush.bf16.msra.mxu1 %v1160_v60  ;;  %909 = vmatpush.bf16.msrb.mxu0 %v1172_v7 }
 0x195   : > { %896 = vmatpush.bf16.msra.mxu3 %v1152_v22 }
 0x198   : > { %868 = vmatpush.bf16.msra.mxu1 %v1144_v13 }
 0x1f8   : > { %v606_v36 = vpop.xlane.xlu1 %605 }
 0x1f9   : > { %v609_v42 = vmul.f32 %v606_v36, %v1893_v20 }
 0x1fb   : > { %v1906_v47 = vadd.f32 1e-05, %v609_v42 }
 0x1fd   : > { %1444 = vrsqrt.f32 %v1906_v47  ;;  %vm619_vm10 = vweird.f32 %v1906_v47 }
 0x200   : > { %v608_v0 = vpop.xlane.xlu1 %607 }
 0x201   : > { %v610_v6 = vmul.f32 %v608_v0, %v1893_v20  ;;  %v1156_v20 = vor.u32 %v1287_v18, %v1153_v12 }
 0x203   : > { %v1445_v19 = vpop.eup %1444  ;;  %v612_v21 = vadd.f32 1e-05, %v610_v6  ;;  %910 = vmatpush.bf16.msrb.mxu0 %v1156_v20 }
 0x204   : > { %v614_v23 = vmul.f32 %v1445_v19, %v1906_v47  ;;  %vm620_vm9 = vweird.f32 %v1445_v19 }
 0x205   : > { %1446 = vrsqrt.f32 %v612_v21  ;;  %vm621_vm11 = vmor %vm619_vm10, %vm620_vm9  ;;  %vm629_vm13 = vweird.f32 %v612_v21 }
 0x206   : > { %v615_v24 = vmul.f32 %v1445_v19, %v614_v23 }
 0x208   : > { %v616_v25 = vmul.f32 0.5, %v615_v24 }
 0x20a   : > { %v617_v26 = vsub.f32 1.5, %v616_v25 }
 0x20b   : > { %v1447_v27 = vpop.eup %1446 }
 0x20c   : > { %v618_v28 = vmul.f32 %v1445_v19, %v617_v26  ;;  %v624_v29 = vmul.f32 %v1447_v27, %v612_v21  ;;  %vm630_vm12 = vweird.f32 %v1447_v27 }
 0x20d   : > { %vm631_vm14 = vmor %vm629_vm13, %vm630_vm12 }
 0x20e   : > { %v625_v30 = vmul.f32 %v1447_v27, %v624_v29  ;;  %v622_v31 = vsel %vm621_vm11, %v1445_v19, %v618_v28 }
 0x20f   : > { %v633_v34 = vmul.f32 %v622_v31, %v1896_v38  ;;  %v685_v38 = vld [vmem:[%s1962_s6] sm:$0xf] }
 0x210   : > { %v626_v11 = vmul.f32 0.5, %v625_v30  ;;  %v687_v47 = vperm.slane %v685_v38, 0  ;;  %v690_v49 = vperm.slane %v685_v38, 3  ;;  %v689_v50 = vperm.slane %v685_v38, 2 }
 0x211   : > { %v639_v17 = vmul.f32 %v1436_v33, %v633_v34 }
 0x212   : > { %v627_v32 = vsub.f32 1.5, %v626_v11 }
 0x213   : > { %v645_v42 = vadd.f32 %v1437_v37, %v639_v17 }
 0x214   : > { %v628_v35 = vmul.f32 %v1447_v27, %v627_v32 }
 0x216   : > { %v632_v36 = vsel %vm631_vm14, %v1447_v27, %v628_v35 }
 0x217   : > { %v634_v39 = vmul.f32 %v632_v36, %v1901_v41  ;;  %v688_v41 = vperm.slane %v685_v38, 1 }
 0x219   : > { %v640_v40 = vmul.f32 %v1436_v33, %v634_v39 }
 0x21b   : > { %v646_v43 = vadd.f32 %v1437_v37, %v640_v40 }
 0x21d   : > { %v1323_v44 = vpack.c.bf16 %v646_v43, %v645_v42 }
 0x21f   : > { %1324 = vst [vmem:[#allocation2] sm:$0xff] %v1323_v44  }
 0x226   : > { %v1285_v45 = vld [vmem:[#allocation2] sm:$0xff] }
 0x227   : > { %869 = vmatmul.bf16.vlgmr.msra.gmra.mxu1 %v1285_v45  ;;  %883 = vmatmul.bf16.vlgmr.msra.gmra.mxu2 %v1285_v45 }
 0x228   : > { %897 = vmatmul.bf16.vlgmr.msra.gmra.mxu3 %v1285_v45  ;;  %911 = vmatmul.bf16.vlgmr.msrb.gmra.mxu0 %v1285_v45 }
 0x2a4   : > { %v870_v46 = vpop.f32.mrf.mxu1 }
 0x2a5   : > { %v912_v48 = vpop.f32.mrf.mxu0  ;;  %v871_v52 = vadd.f32 %v870_v46, %v687_v47 }
 0x2a6   : > { %v913_v55 = vadd.f32 %v912_v48, %v690_v49 }
 0x2aa   : > { %v884_v51 = vpop.f32.mrf.mxu2 }
 0x2ab   : > { %v885_v53 = vadd.f32 %v884_v51, %v688_v41  ;;  %v898_v54 = vpop.f32.mrf.mxu3 }
 0x2ac   : > { %v899_v56 = vadd.f32 %v898_v54, %v689_v50  ;;  %v872_v59 = vpop.f32.mrf.mxu1 }
 0x2ad   : > { %v917_v57 = vpack.c.bf16 %v885_v53, %v871_v52  ;;  %v914_v60 = vpop.f32.mrf.mxu0  ;;  %v873_v62 = vadd.f32 %v872_v59, %v687_v47 }
 0x2ae   : > { %v918_v58 = vpack.c.bf16 %v913_v55, %v899_v56  ;;  %v915_v1 = vadd.f32 %v914_v60, %v690_v49 }
 0x2af   : > { %921 = vst [vmem:[%s396_s23] sm:$0xff] %v917_v57 }
 0x2b0   : > { %922 = vst [vmem:[%s396_s23 + $0x8] sm:$0xff] %v918_v58 }
 0x2b2   : > { %v886_v61 = vpop.f32.mrf.mxu2 }
 0x2b3   : > { %v887_v63 = vadd.f32 %v886_v61, %v688_v41  ;;  %v900_v0 = vpop.f32.mrf.mxu3 }
 0x2b4   : > { %v901_v2 = vadd.f32 %v900_v0, %v689_v50 }
 0x2b5   : > { %v919_v3 = vpack.c.bf16 %v887_v63, %v873_v62 }
 0x2b6   : > { %v920_v4 = vpack.c.bf16 %v915_v1, %v901_v2 }
 0x2b7   : > { %923 = vst [vmem:[%s396_s23 + $0x10] sm:$0xff] %v919_v3 }
 0x2b8   : > { %924 = vst [vmem:[%s396_s23 + $0x18] sm:$0xff] %v920_v4 }
 0x2b9   : > { %1625 = shalt.err (!%p1622_p0)
}
 0x2ba   : > { %s1699_s20 = smov 256   ;;  %s1700_s9 = smov 16  }
 0x2bb   : > { %1343 = dma.vmem_to_hbm [thread:$0]  (%p1838_p2), %s942_s21, 512, %s944_s12, %s926_s27, %s1699_s20, %s1699_s20, %s1700_s9  }
 0x2bc PF: > { %s958_s10 = sand.u32 1, %s1668_s24   ;;  %p1363_p4 = pnand %p1088_p10, %p1788_p5 }
 0x2bd   : > { %s959_s15 = scalar_lea.sflag [#allocation5], %s958_s10 }
 0x2be   : > { %p1364_p6 = pneg %p1363_p4 }
 0x2c0   : > { %1663 = dma.done.wait (%p1364_p6), %s959_s15, 512  }
 0x2c1   : > { %1665 = vsyncadd (%p1364_p6), %s959_s15, 4294966784  ;;  %s25_s29 = sadd.s32 1, %s1688_s29   ;;  %s1984_s24 = smov %s1672_s25 }
 0x2c2   : > { %p22_p8 = scmp.ge.s32.totalorder %s25_s29, 4   ;;  %s1985_s25 = smov %s1676_s26 }
 0x2c3   : > { %s1986_s26 = smov %s1848_s8  ;;  %s1987_s27 = smov %s1684_s28 }
 0x2c4   : > { %s1988_s28 = smov %s1990_s19  ;;  %24 = sbr.rel (!%p22_p8) target bundleno = 13 (0xd), region = 117 }
 0x2c9   :  { %965 = vsyncpa [#allocation4], 1 }
 0x2ca   :  { %967 = vsyncpa [#allocation4 + $0x1], 1 }
 0x2cb   :  { %968 = vsyncpa [#allocation7], 1 }
 0x2cc   :  { %969 = vsyncpa [#allocation10], 1 }
 0x2cd   :  { %970 = vsyncpa [#allocation5], 1 }
 0x2ce   :  { %972 = vsyncpa [#allocation5 + $0x1], 1 }

// kernel: tpu_custom_call.1
= control target key start
LH: loop header
LB: loop body
LE: loop exit
PB: predicated region body
PF: predicated region fallthrough
CT: control target
= control target key end

     0   :  { %s1956_s0 = inlined_call_operand.hbm [shape: bf16[32,128], index: 0, kind: input, shape index: {}]   ;;  %s1957_s1 = inlined_call_operand.hbm [shape: bf16[128,128], index: 1, kind: input, shape index: {}]   ;;  %s1958_s2 = inlined_call_operand.vmem [shape: f32[1,128], index: 2, kind: input, shape index: {}]   ;;  %s1959_s3 = inlined_call_operand.hbm [shape: f32[1,128], index: 3, kind: input, shape index: {}]   ;;  %s1960_s4 = inlined_call_operand.hbm [shape: f32[1,128], index: 4, kind: input, shape index: {}]   ;;  %s1961_s5 = inlined_call_operand.hbm [shape: bf16[128,512], index: 5, kind: input, shape index: {}]   ;;  %s1962_s6 = inlined_call_operand.vmem [shape: f32[1,512], index: 6, kind: input, shape index: {}]   ;;  %s1963_s7 = inlined_call_operand.hbm [shape: bf16[32,512], index: 7, kind: output, shape index: {}]  }
   0x1   :  { %1967 = sst [smem:[#allocation17_spill]] %s1957_s1 }
   0x2   :  { %1968 = sst [smem:[#allocation18_spill]] %s1959_s3 }
   0x3   :  { %1969 = sst [smem:[#allocation19_spill]] %s1960_s4 }
   0x4   :  { %1970 = sst [smem:[#allocation20_spill]] %s1961_s5 }
   0x5   :  { %12 = vsyncpa [#allocation4], 0 }
   0x6   :  { %14 = vsyncpa [#allocation4 + $0x1], 0 }
   0x7   :  { %15 = vsyncpa [#allocation7], 0 }
   0x8   :  { %16 = vsyncpa [#allocation10], 0 }
   0x9   :  { %17 = vsyncpa [#allocation5], 0 }
   0xa   :  { %19 = vsyncpa [#allocation5 + $0x1], 0  ;;  %s1741_s24 = smov 0   ;;  %s1743_s25 = smov 0  }
   0xb   :  { %s1745_s26 = smov 0   ;;  %s1747_s27 = smov 0  }
   0xc   :  { %s1749_s28 = smov 0   ;;  %s1751_s29 = smov 0  }
   0xd LB: > { %s1964_s30 = sadd.s32 4294967295, %s1688_s29   ;;  %s1081_s8 = sadd.s32 4294967294, %s1688_s29   ;;  %s1688_s29 = sphi %s1751_s29, %s25_s29   ;;  %s1684_s28 = sphi %s1749_s28, %s1988_s28   ;;  %s1680_s27 = sphi %s1747_s27, %s1987_s27   ;;  %s1676_s26 = sphi %s1745_s26, %s1986_s26   ;;  %s1672_s25 = sphi %s1743_s25, %s1985_s25   ;;  %s1668_s24 = sphi %s1741_s24, %s1984_s24  }
   0xe   : > { %p57_p0 = scmp.ne.s32.totalorder %s1672_s25, %s1668_s24  ;;  %p1777_p1 = scmp.eq.s32.totalorder %s1964_s30, 0 }
   0xf   : > { %p225_p2 = scmp.eq.s32.totalorder %s1081_s8, 1  ;;  %p1082_p4 = scmp.ge.s32.totalorder %s1688_s29, 1 }
  0x10   : > { %p1783_p3 = por %p1777_p1, %p57_p0  ;;  %p232_p6 = scmp.lt.s32.totalorder %s1688_s29, 3 }
  0x11   : > { %p1788_p5 = por %p225_p2, %p57_p0  ;;  %s1974_s1 = sld [smem:[#allocation17_spill]] }
  0x12   : > { %p1796_p7 = pnand %p1082_p4, %p232_p6  ;;  %s1690_s16 = smov [#allocation6]  }
  0x13   : > { %s245_s17 = sshll.u32 %s1690_s16, 4  ;;  %p1088_p10 = scmp.ge.s32.totalorder %s1688_s29, 2  ;;  %s246_s17 = int_to_ptr.vmem [resolvable:$true] %s245_s17 }
  0x14   : > { %p1345_p8 = pneg %p1796_p7  ;;  %s1977_s4 = sld [smem:[#allocation19_spill]] }
  0x15   : > { %s1965_s22 = smov 64   ;;  %s1966_s23 = smov 4  }
  0x16   : > { %p1804_p9 = pnand %p1345_p8, %p1777_p1  ;;  %s1693_s8 = smov [#allocation9]  }
  0x17   : > { %s243_s14 = sshll.u32 %s1974_s1, 4  ;;  %s275_s12 = sshll.u32 %s1693_s8, 4  ;;  %s244_s14 = int_to_ptr.hbm [resolvable:$true] %s243_s14  ;;  %s276_s12 = int_to_ptr.vmem [resolvable:$true] %s275_s12 }
  0x18   : > { %1348 = dma.hbm_to_vmem [thread:$0]  (!%p1804_p9), %s244_s14, 1024, %s246_s17, [#allocation7], %s1965_s22, %s1965_s22, %s1966_s23  }
  0x19   : > { %s1978_s3 = sld [smem:[#allocation18_spill]]  ;;  %s1694_s14 = smov [#allocation8]  }
  0x1a   : > { %s273_s21 = sshll.u32 %s1977_s4, 4  ;;  %s1979_s5 = sld [smem:[#allocation20_spill]]  ;;  %s274_s21 = int_to_ptr.hbm [resolvable:$true] %s273_s21 }
  0x1b   : > { %1354 = dma.hbm_to_vmem [thread:$0]  (!%p1804_p9), %s274_s21, 16, %s276_s12, [#allocation10]  }
  0x1c   : > { %s263_s17 = sshll.u32 %s1694_s14, 4  ;;  %s1695_s8 = smov [#allocation11]   ;;  %s264_s17 = int_to_ptr.vmem [resolvable:$true] %s263_s17 }
  0x1d   : > { %s289_s13 = sshll.u32 %s1695_s8, 4  ;;  %s1696_s21 = smov 256   ;;  %s290_s13 = int_to_ptr.vmem [resolvable:$true] %s289_s13 }
  0x1e   : > { %s1697_s12 = smov 16   ;;  %s1980_s16 = sadd.s32 4294967295, %s1688_s29  }
  0x1f   : > { %s261_s30 = sshll.u32 %s1978_s3, 4  ;;  %p219_p11 = scmp.eq.s32.totalorder %s1980_s16, 1  ;;  %s262_s30 = int_to_ptr.hbm [resolvable:$true] %s261_s30 }
  0x20   : > { %s287_s1 = sshll.u32 %s1979_s5, 4  ;;  %s37_s19 = sadd.s32 1, %s1684_s28  ;;  %s288_s1 = int_to_ptr.hbm [resolvable:$true] %s287_s1 }
  0x21   : > { %1351 = dma.hbm_to_vmem [thread:$0]  (!%p1804_p9), %s262_s30, 16, %s264_s17, [#allocation7]  }
  0x22   : > { %1357 = dma.hbm_to_vmem [thread:$0]  (!%p1804_p9), %s288_s1, 4096, %s290_s13, [#allocation10], %s1696_s21, %s1696_s21, %s1697_s12  }
  0x23   : > { %p39_p12 = scmp.ge.s32.totalorder %s37_s19, 2  ;;  %s44_s20 = sadd.s32 1, %s1676_s26 }
  0x24   : > { %p51_p13 = scmp.ne.s32.totalorder %s1676_s26, %s1672_s25  ;;  %p52_p0 = scmp.eq.s32.totalorder %s1688_s29, 0 }
  0x25   : > { %s1990_s19 = smov (%p39_p12, %s37_s19), 0  ;;  %p1370_p4 = scmp.lt.s32.totalorder %s1688_s29, 2 }
  0x26   : > { %p1838_p2 = por %p219_p11, %p51_p13  ;;  %s41_s18 = ssub.s32 %s1684_s28, %s1990_s19 }
  0x27   : > { %s311_s14 = sand.u32 1, %s1676_s26   ;;  %p42_p6 = scmp.eq.s32.totalorder %s41_s18, 0 }
  0x28   : > { %p53_p8 = por %p52_p0, %p51_p13  ;;  %s1089_s1 = sshll.u32 %s311_s14, 3 }
  0x29   : > { %s1275_s17 = sshll.u32 %s1684_s28, 3  ;;  %s315_s22 = scalar_lea.vmem [#allocation3], %s1089_s1 }
  0x2a   : > { %s1848_s8 = scalar_select %p42_p6, %s1676_s26, %s44_s20  }
  0x2b   : > { %s320_s12 = scalar_lea.hbm %s1956_s0, %s1275_s17  ;;  %s323_s23 = sshll.u32 %s315_s22, 4  ;;  %s324_s23 = int_to_ptr.vmem [resolvable:$true] %s323_s23 }
  0x2c   : > { %s321_s16 = sshll.u32 %s320_s12, 4  ;;  %p1359_p9 = pnand %p1370_p4, %p53_p8  ;;  %s322_s16 = int_to_ptr.hbm [resolvable:$true] %s321_s16 }
  0x2d   : > { %s312_s3 = scalar_lea.sflag [#allocation4], %s311_s14  ;;  %s1982_s4 = smov 4  }
  0x2e   : > { %s1983_s5 = smov 64   ;;  %335 = sbr.rel (%p1796_p7) target bundleno = 700 (0x2bc), region = 48 }
  0x2f   : > { %1361 = dma.hbm_to_vmem [thread:$0]  (!%p1359_p9), %s322_s16, 128, %s324_s23, %s312_s3, %s1983_s5, %s1983_s5, %s1982_s4  }
  0x30   : > { %s1861_s20 = sand.u32 (!%p1796_p7), 1, %s1672_s25  }
  0x31   : > { %s1093_s18 = sshll.u32 (!%p1796_p7), %s1861_s20, 3  ;;  %s338_s22 = scalar_lea.sflag (!%p1796_p7), [#allocation4], %s1861_s20 }
  0x32   : > { %s341_s1 = scalar_lea.vmem (!%p1796_p7), [#allocation3], %s1093_s18 }
  0x33   : > { %1651 = dma.done.wait (%p1783_p3), %s338_s22, 128  }
  0x34   : > { %1653 = vsyncadd (%p1783_p3), %s338_s22, 4294967168 }
  0x35   : > { %1655 = dma.done.wait (%p1777_p1), [#allocation7], 1040  }
  0x36   : > { %1657 = vsyncadd (%p1777_p1), [#allocation7], 4294966256 }
  0x37   : > { %1659 = dma.done.wait (%p1777_p1), [#allocation10], 4112  }
  0x38   : > { %1661 = vsyncadd (%p1777_p1), [#allocation10], 4294963184  ;;  %v1284_v0 = vld [vmem:[#allocation6 + $0x38] sm:$0xff]  ;;  %v1283_v1 = vld [vmem:[#allocation6 + $0x30] sm:$0xff]  ;;  %s1098_s10 = sshll.u32 %s1861_s20, 5  ;;  %s1319_s15 = sshll.u32 %s1680_s27, 5 }
  0x39   : > { %486 = vmatpush.bf16.msra.mxu0 %v1284_v0  ;;  %v1282_v2 = vld [vmem:[#allocation6 + $0x28] sm:$0xff]  ;;  %v1281_v3 = vld [vmem:[#allocation6 + $0x20] sm:$0xff]  ;;  %v1280_v4 = vld [vmem:[#allocation6 + $0x18] sm:$0xff]  ;;  %s396_s23 = scalar_lea.vmem [#allocation12], %s1098_s10  ;;  %s940_s13 = scalar_lea.hbm %s1963_s7, %s1319_s15 }
  0x3a   : > { %v1279_v5 = vld [vmem:[#allocation6 + $0x10] sm:$0xff]  ;;  %v1278_v6 = vld [vmem:[#allocation6 + $0x8] sm:$0xff]  ;;  %v1277_v7 = vld [vmem:[#allocation6] sm:$0xff]  ;;  %s941_s21 = sshll.u32 %s396_s23, 4  ;;  %s943_s12 = sshll.u32 %s940_s13, 4  ;;  %s942_s21 = int_to_ptr.vmem [resolvable:$true] %s941_s21  ;;  %s944_s12 = int_to_ptr.hbm [resolvable:$true] %s943_s12 }
  0x3b   : > { %v1276_v8 = vld [vmem:[%s341_s1] sm:$0xff]  ;;  %v1435_v9 = vld [vmem:[%s1958_s2] ss:$0 sm:$0xff]  ;;  %s926_s27 = scalar_lea.sflag [#allocation5], %s1861_s20  ;;  %s1612_s16 = sshra.s32 %s944_s12, 4  ;;  %s1613_s16 = int_to_ptr.hbm [resolvable:$true] %s1612_s16 }
  0x3c   : > { %s1614_s18 = scalar_lea.hbm %s1613_s16, 32  ;;  %s1618_s3 = scalar_lea.hbm %s1963_s7, 64 }
  0x3d   : > { %487 = vmatpush.bf16.msra.mxu0 %v1283_v1  ;;  %p1615_p1 = scmp.ne.s32.totalorder %s1613_s16, %s1614_s18  ;;  %p1619_p11 = scmp.lt.s32.totalorder %s1613_s16, %s1963_s7 }
  0x3e   : > { %p1620_p12 = scmp.lt.s32.totalorder %s1618_s3, %s1614_s18 }
  0x3f   : > { %p1616_p3 = pnand %p1615_p1, %p1838_p2 }
  0x40   : > { %p1621_p13 = por %p1620_p12, %p1619_p11 }
  0x41   : > { %488 = vmatpush.bf16.msra.mxu0 %v1282_v2  ;;  %p1617_p7 = pneg %p1616_p3 }
  0x43   : > { %p1622_p0 = pnand %p1621_p13, %p1617_p7 }
  0x45   : > { %489 = vmatpush.bf16.msra.mxu0 %v1281_v3 }
  0x49   : > { %490 = vmatpush.bf16.msra.mxu0 %v1280_v4 }
  0x4d   : > { %491 = vmatpush.bf16.msra.mxu0 %v1279_v5 }
  0x51   : > { %492 = vmatpush.bf16.msra.mxu0 %v1278_v6 }
  0x55   : > { %493 = vmatpush.bf16.msra.mxu0 %v1277_v7 }
  0x58   : > { %494 = vmatmul.bf16.vlgmr.msra.gmra.mxu0 %v1276_v8 }
  0xd5   : > { %v495_v10 = vpop.f32.mrf.mxu0 }
  0xd6   : > { %v1880_v11 = vadd.f32 %v1435_v9, %v495_v10 }
  0xd8   : > { %v502_v12 = vmul.f32 0.70710677, %v1880_v11 }
  0xda   : > { %v504_v13 = vmul.f32 %v502_v12, %v502_v12 }
  0xdc   : > { %v505_v14 = vmin.f32 %v504_v13, 16.0 }
  0xdd   : > { %v497_v15 = vpop.f32.mrf.mxu0 }
  0xde   : > { %v506_v16 = vmul.f32 2.1237322e-06, %v505_v14  ;;  %v1883_v17 = vadd.f32 %v1435_v9, %v497_v15  ;;  %v517_v18 = vmul.f32 3.8918573e-05, %v505_v14 }
  0xe0   : > { %v507_v19 = vadd.f32 0.00028619796, %v506_v16  ;;  %v1886_v20 = vmul.f32 0.70710677, %v1883_v17  ;;  %v518_v21 = vadd.f32 0.001143296, %v517_v18 }
  0xe2   : > { %v508_v22 = vmul.f32 %v507_v19, %v505_v14  ;;  %v544_v23 = vmul.f32 %v1886_v20, %v1886_v20  ;;  %v519_v24 = vmul.f32 %v518_v21, %v505_v14  ;;  %v500_v19 = vmul.f32 0.5, %v1880_v11 }
  0xe4   : > { %v545_v25 = vmin.f32 %v544_v23, 16.0  ;;  %v520_v26 = vadd.f32 0.014752088, %v519_v24  ;;  %v509_v27 = vadd.f32 0.0036580483, %v508_v22 }
  0xe6   : > { %v546_v28 = vmul.f32 2.1237322e-06, %v545_v25  ;;  %v557_v29 = vmul.f32 3.8918573e-05, %v545_v25  ;;  %v521_v30 = vmul.f32 %v520_v26, %v505_v14  ;;  %v510_v34 = vmul.f32 %v509_v27, %v505_v14 }
  0xe8   : > { %v547_v31 = vadd.f32 0.00028619796, %v546_v28  ;;  %v558_v32 = vadd.f32 0.001143296, %v557_v29  ;;  %v522_v33 = vadd.f32 0.112945676, %v521_v30 }
  0xe9   : > { %v511_v41 = vadd.f32 0.05243302, %v510_v34  ;;  %v501_v28 = vmul.f32 0.5, %v1883_v17 }
  0xea   : > { %v548_v35 = vmul.f32 %v547_v31, %v545_v25  ;;  %v559_v36 = vmul.f32 %v558_v32, %v545_v25  ;;  %v523_v37 = vmul.f32 %v522_v33, %v505_v14  ;;  %v1698_v31 = vmov 128.0  }
  0xeb   : > { %v512_v47 = vmul.f32 %v511_v41, %v505_v14 }
  0xec   : > { %v560_v38 = vadd.f32 0.014752088, %v559_v36  ;;  %v549_v39 = vadd.f32 0.0036580483, %v548_v35  ;;  %v524_v40 = vadd.f32 0.4994258, %v523_v37 }
  0xed   : > { %v513_v51 = vadd.f32 0.18741608, %v512_v47  ;;  %v1257_v47 = vld [vmem:[#allocation11 + $0xf0] sm:$0xf0] }
  0xee   : > { %v561_v42 = vmul.f32 %v560_v38, %v545_v25  ;;  %v525_v43 = vmul.f32 %v524_v40, %v505_v14  ;;  %v550_v45 = vmul.f32 %v549_v39, %v545_v25 }
  0xef   : > { %v514_v56 = vmul.f32 %v513_v51, %v505_v14 }
  0xf0   : > { %v562_v44 = vadd.f32 0.112945676, %v561_v42  ;;  %v526_v46 = vadd.f32 1.0, %v525_v43  ;;  %v551_v50 = vadd.f32 0.05243302, %v550_v45 }
  0xf1   : > { %v515_v61 = vadd.f32 1.1283791, %v514_v56  ;;  %v1255_v43 = vld [vmem:[#allocation11 + $0xe0] sm:$0xf]  ;;  %v1314_v45 = vld [vmem:[#allocation11 + $0xe4] sm:$0xf] }
  0xf2   : > { %v563_v48 = vmul.f32 %v562_v44, %v545_v25  ;;  %1438 = vrcp.f32 %v526_v46  ;;  %v552_v55 = vmul.f32 %v551_v50, %v545_v25  ;;  %v538_v60 = vand.u32 2147483648, %v526_v46  ;;  %v1316_v44 = vld [vmem:[#allocation11 + $0xec] sm:$0xf0] }
  0xf3   : > { %v536_v63 = vand.u32 2147483647, %v526_v46  ;;  %vm532_vm1 = vweird.f32 %v526_v46  ;;  %v516_v5 = vmul.f32 %v515_v61, %v502_v12  ;;  %v1260_v50 = vor.u32 %v1314_v45, %v1257_v47  ;;  %v1312_v56 = vld [vmem:[#allocation11 + $0xcc] sm:$0xf0]  ;;  %v1313_v61 = vld [vmem:[#allocation11 + $0xd4] sm:$0xf0] }
  0xf4   : > { %v564_v49 = vadd.f32 0.4994258, %v563_v48  ;;  %v553_v59 = vadd.f32 0.18741608, %v552_v55  ;;  %v539_v3 = vor.u32 1.1754944e-38, %v538_v60 }
  0xf5   : > { %vm537_vm3 = vcmp.eq.f32.partialorder %v536_v63, 8.507059e+37  ;;  %v1263_v48 = vld [vmem:[#allocation11 + $0xe8] sm:$0xf]  ;;  %875 = vmatpush.bf16.msra.mxu2 %v1260_v50  ;;  %v1239_v55 = vld [vmem:[#allocation11 + $0xc0] sm:$0xf] }
  0xf6   : > { %v565_v52 = vmul.f32 %v564_v49, %v545_v25  ;;  %v554_v2 = vmul.f32 %v553_v59, %v545_v25  ;;  %v1317_v49 = vld [vmem:[#allocation11 + $0xf4] sm:$0xf0]  ;;  %v1241_v59 = vld [vmem:[#allocation11 + $0xd0] sm:$0xf0]  ;;  %v1247_v60 = vld [vmem:[#allocation11 + $0xc8] sm:$0xf] }
  0xf7   : > { %v1264_v51 = vor.u32 %v1317_v49, %v1263_v48  ;;  %v1248_v63 = vor.u32 %v1313_v61, %v1247_v60  ;;  %v1296_v45 = vld [vmem:[#allocation11 + $0x4c] sm:$0xf0]  ;;  %v1177_v49 = vld [vmem:[#allocation11 + $0x50] sm:$0xf0]  ;;  %v1183_v50 = vld [vmem:[#allocation11 + $0x48] sm:$0xf] }
  0xf8   : > { %v566_v53 = vadd.f32 1.0, %v565_v52  ;;  %v1439_v54 = vpop.eup %1438  ;;  %v555_v13 = vadd.f32 1.1283791, %v554_v2  ;;  %v1315_v52 = vld [vmem:[#allocation11 + $0xec] sm:$0xf] }
  0xf9   : > { %v528_v57 = vmul.f32 %v1439_v54, %v526_v46  ;;  %vm533_vm0 = vweird.f32 %v1439_v54  ;;  %v1256_v46 = vor.u32 %v1316_v44, %v1255_v43  ;;  %889 = vmatpush.bf16.msra.mxu3 %v1264_v51  ;;  %v1175_v44 = vld [vmem:[#allocation11 + $0x40] sm:$0xf]  ;;  %v1161_v61 = vld [vmem:[#allocation11 + $0x30] sm:$0xf0] }
  0xfa   : > { %1440 = vrcp.f32 %v566_v53  ;;  %vm534_vm2 = vmor %vm532_vm1, %vm533_vm0  ;;  %v578_v10 = vand.u32 2147483648, %v566_v53  ;;  %v576_v15 = vand.u32 2147483647, %v566_v53  ;;  %vm572_vm5 = vweird.f32 %v566_v53 }
  0xfb   : > { %v529_v58 = vsub.f32 1.0, %v528_v57  ;;  %v556_v12 = vmul.f32 %v555_v13, %v1886_v20  ;;  %1442 = vrcp.f32 %v1698_v31  ;;  %861 = vmatpush.bf16.msra.mxu1 %v1256_v46  ;;  %v1310_v57 = vld [vmem:[#allocation11 + $0xc4] sm:$0xf]  ;;  %v1300_v31 = vld [vmem:[#allocation11 + $0x6c] sm:$0xf0]  ;;  %v1176_v48 = vor.u32 %v1296_v45, %v1175_v44 }
  0xfc   : > { %v579_v22 = vor.u32 1.1754944e-38, %v578_v10  ;;  %vm577_vm7 = vcmp.eq.f32.partialorder %v576_v15, 8.507059e+37  ;;  %v1233_v15 = vld [vmem:[#allocation11 + $0xb8] sm:$0xf0]  ;;  %v1294_v46 = vld [vmem:[#allocation11 + $0x44] sm:$0xf] }
  0xfd   : > { %v530_v62 = vmul.f32 %v1439_v54, %v529_v58  ;;  %v1240_v58 = vor.u32 %v1312_v56, %v1239_v55  ;;  %890 = vmatpush.bf16.msra.mxu3 %v1248_v63  ;;  %v1180_v51 = vor.u32 %v1294_v46, %v1177_v49  ;;  %v1293_v63 = vld [vmem:[#allocation11 + $0x34] sm:$0xf0] }
  0xff   : > { %v531_v1 = vadd.f32 %v1439_v54, %v530_v62  ;;  %v1244_v62 = vor.u32 %v1310_v57, %v1241_v59  ;;  %862 = vmatpush.bf16.msra.mxu1 %v1240_v58  ;;  %v1159_v57 = vld [vmem:[#allocation11 + $0x20] sm:$0xf]  ;;  %v1292_v58 = vld [vmem:[#allocation11 + $0x2c] sm:$0xf0]  ;;  %v1290_v59 = vld [vmem:[#allocation11 + $0x24] sm:$0xf] }
 0x100   : > { %v1441_v0 = vpop.eup %1440  ;;  %v1160_v60 = vor.u32 %v1292_v58, %v1159_v57 }
 0x101   : > { %v568_v4 = vmul.f32 %v1441_v0, %v566_v53  ;;  %v535_v6 = vsel %vm534_vm2, %v1439_v54, %v531_v1  ;;  %vm573_vm4 = vweird.f32 %v1441_v0  ;;  %v1443_v11 = vpop.eup %1442  ;;  %v1265_v53 = vld [vmem:[#allocation11 + $0xf8] sm:$0xf0]  ;;  %876 = vmatpush.bf16.msra.mxu2 %v1244_v62  ;;  %v1167_v62 = vld [vmem:[#allocation11 + $0x28] sm:$0xf] }
 0x102   : > { %v540_v7 = vsel %vm537_vm3, %v539_v3, %v535_v6  ;;  %vm574_vm6 = vmor %vm572_vm5, %vm573_vm4  ;;  %v593_v32 = vmul.f32 128.0, %v1443_v11  ;;  %vm597_vm8 = vweird.f32 %v1443_v11  ;;  %v1268_v54 = vor.u32 %v1315_v52, %v1265_v53  ;;  %v1249_v1 = vld [vmem:[#allocation11 + $0xd8] sm:$0xf0]  ;;  %v1223_v3 = vld [vmem:[#allocation11 + $0xa0] sm:$0xf] }
 0x103   : > { %v569_v8 = vsub.f32 1.0, %v568_v4  ;;  %v541_v9 = vmul.f32 %v540_v7, %v516_v5  ;;  %v1308_v4 = vld [vmem:[#allocation11 + $0xac] sm:$0xf0]  ;;  %v1306_v5 = vld [vmem:[#allocation11 + $0xa4] sm:$0xf] }
 0x104   : > { %v594_v33 = vsub.f32 1.0, %v593_v32  ;;  %903 = vmatpush.bf16.msrb.mxu0 %v1268_v54  ;;  %v1224_v6 = vor.u32 %v1308_v4, %v1223_v3  ;;  %v1225_v7 = vld [vmem:[#allocation11 + $0xb0] sm:$0xf0]  ;;  %v1297_v52 = vld [vmem:[#allocation11 + $0x54] sm:$0xf0] }
 0x105   : > { %v570_v14 = vmul.f32 %v1441_v0, %v569_v8  ;;  %v1135_v16 = vclamps-f32 %v541_v9, 1.0  ;;  %v1231_v8 = vld [vmem:[#allocation11 + $0xa8] sm:$0xf]  ;;  %v1309_v9 = vld [vmem:[#allocation11 + $0xb4] sm:$0xf0]  ;;  %v1228_v10 = vor.u32 %v1306_v5, %v1225_v7  ;;  %v1184_v55 = vor.u32 %v1297_v52, %v1183_v50 }
 0x106   : > { %v595_v34 = vmul.f32 %v1443_v11, %v594_v33  ;;  %v1232_v13 = vor.u32 %v1309_v9, %v1231_v8  ;;  %863 = vmatpush.bf16.msra.mxu1 %v1224_v6  ;;  %v1193_v33 = vld [vmem:[#allocation11 + $0x70] sm:$0xf0]  ;;  %v1295_v53 = vld [vmem:[#allocation11 + $0x4c] sm:$0xf]  ;;  %v1185_v54 = vld [vmem:[#allocation11 + $0x58] sm:$0xf0] }
 0x107   : > { %v571_v18 = vadd.f32 %v1441_v0, %v570_v14  ;;  %v584_v21 = vadd.f32 1.0, %v1135_v16  ;;  %v1307_v14 = vld [vmem:[#allocation11 + $0xac] sm:$0xf]  ;;  %877 = vmatpush.bf16.msra.mxu2 %v1228_v10  ;;  %v1188_v56 = vor.u32 %v1295_v53, %v1185_v54  ;;  %v1169_v4 = vld [vmem:[#allocation11 + $0x38] sm:$0xf0] }
 0x108   : > { %v596_v35 = vadd.f32 %v1443_v11, %v595_v34  ;;  %v1236_v16 = vor.u32 %v1307_v14, %v1233_v15  ;;  %891 = vmatpush.bf16.msra.mxu3 %v1232_v13  ;;  %v1199_v34 = vld [vmem:[#allocation11 + $0x68] sm:$0xf]  ;;  %v1291_v3 = vld [vmem:[#allocation11 + $0x2c] sm:$0xf]  ;;  %v1143_v5 = vld [vmem:[#allocation11] sm:$0xf] }
 0x109   : > { %v575_v23 = vsel %vm574_vm6, %v1441_v0, %v571_v18  ;;  %v586_v24 = vmul.f32 %v584_v21, %v500_v19  ;;  %v1311_v0 = vld [vmem:[#allocation11 + $0xcc] sm:$0xf]  ;;  %v1207_v18 = vld [vmem:[#allocation11 + $0x80] sm:$0xf]  ;;  %v1304_v19 = vld [vmem:[#allocation11 + $0x8c] sm:$0xf0]  ;;  %v1172_v7 = vor.u32 %v1291_v3, %v1169_v4 }
 0x10a   : > { %v580_v25 = vsel %vm577_vm7, %v579_v22, %v575_v23  ;;  %v1893_v20 = vsel %vm597_vm8, %v1443_v11, %v596_v35  ;;  %v1252_v2 = vor.u32 %v1311_v0, %v1249_v1  ;;  %v1302_v21 = vld [vmem:[#allocation11 + $0x84] sm:$0xf]  ;;  %v1208_v22 = vor.u32 %v1304_v19, %v1207_v18  ;;  %v1215_v23 = vld [vmem:[#allocation11 + $0x88] sm:$0xf]  ;;  %v1301_v35 = vld [vmem:[#allocation11 + $0x74] sm:$0xf0] }
 0x10b   : > { %v581_v26 = vmul.f32 %v580_v25, %v556_v12  ;;  %588 = vadd.xlane.f32.xlu0 %v586_v24  ;;  %v1209_v12 = vld [vmem:[#allocation11 + $0x90] sm:$0xf0]  ;;  %v1298_v11 = vld [vmem:[#allocation11 + $0x64] sm:$0xf]  ;;  %v1164_v1 = vor.u32 %v1290_v59, %v1161_v61  ;;  %v1288_v8 = vld [vmem:[#allocation11 + $0xc] sm:$0xf0] }
 0x10c   : > { %904 = vmatpush.bf16.msrb.mxu0 %v1252_v2  ;;  %v1212_v25 = vor.u32 %v1302_v21, %v1209_v12  ;;  %864 = vmatpush.bf16.msra.mxu1 %v1208_v22  ;;  %v1168_v2 = vor.u32 %v1293_v63, %v1167_v62  ;;  %v1286_v9 = vld [vmem:[#allocation11 + $0x4] sm:$0xf]  ;;  %v1145_v10 = vld [vmem:[#allocation11 + $0x10] sm:$0xf0]  ;;  %v1144_v13 = vor.u32 %v1288_v8, %v1143_v5  ;;  %v1151_v15 = vld [vmem:[#allocation11 + $0x8] sm:$0xf] }
 0x10d   : > { %v1136_v27 = vclamps-f32 %v581_v26, 1.0  ;;  %v1148_v14 = vor.u32 %v1286_v9, %v1145_v10  ;;  %v1287_v18 = vld [vmem:[#allocation11 + $0xc] sm:$0xf]  ;;  %v1153_v12 = vld [vmem:[#allocation11 + $0x18] sm:$0xf0] }
 0x10e   : > { %878 = vmatpush.bf16.msra.mxu2 %v1212_v25 }
 0x10f   : > { %v585_v29 = vadd.f32 1.0, %v1136_v27  ;;  %v1303_v27 = vld [vmem:[#allocation11 + $0x8c] sm:$0xf] }
 0x110   : > { %905 = vmatpush.bf16.msrb.mxu0 %v1236_v16  ;;  %v1289_v16 = vld [vmem:[#allocation11 + $0x14] sm:$0xf0] }
 0x111   : > { %v587_v30 = vmul.f32 %v585_v29, %v501_v28  ;;  %v1217_v28 = vld [vmem:[#allocation11 + $0x98] sm:$0xf0]  ;;  %v1152_v22 = vor.u32 %v1289_v16, %v1151_v15 }
 0x112   : > { %v1220_v29 = vor.u32 %v1303_v27, %v1217_v28 }
 0x113   : > { %590 = vadd.xlane.f32.xlu0 %v587_v30 }
 0x114   : > { %906 = vmatpush.bf16.msrb.mxu0 %v1220_v29 }
 0x17e   : > { %v589_v36 = vpop.xlane.xlu0 %588 }
 0x17f   : > { %v599_v37 = vmul.f32 %v1893_v20, %v589_v36 }
 0x181   : > { %v1896_v38 = vsub.f32 %v586_v24, %v599_v37  ;;  %v1305_v24 = vld [vmem:[#allocation11 + $0x94] sm:$0xf0]  ;;  %v1196_v37 = vor.u32 %v1298_v11, %v1193_v33  ;;  %v1436_v33 = vld [vmem:[#allocation8] ss:$0 sm:$0xff] }
 0x182   : > { %v1216_v26 = vor.u32 %v1305_v24, %v1215_v23 }
 0x183   : > { %v603_v17 = vmul.f32 %v1896_v38, %v1896_v38  ;;  %879 = vmatpush.bf16.msra.mxu2 %v1196_v37  ;;  %v1437_v37 = vld [vmem:[#allocation9] ss:$0 sm:$0xff] }
 0x184   : > { %892 = vmatpush.bf16.msra.mxu3 %v1216_v26 }
 0x185   : > { %605 = vadd.xlane.f32.xlu1 %v603_v17  ;;  %v1200_v17 = vor.u32 %v1301_v35, %v1199_v34 }
 0x186   : > { %v591_v39 = vpop.xlane.xlu0 %590 }
 0x187   : > { %v600_v40 = vmul.f32 %v1893_v20, %v591_v39  ;;  %v1299_v39 = vld [vmem:[#allocation11 + $0x6c] sm:$0xf]  ;;  %880 = vmatpush.bf16.msra.mxu2 %v1180_v51 }
 0x188   : > { %893 = vmatpush.bf16.msra.mxu3 %v1200_v17 }
 0x189   : > { %v1901_v41 = vsub.f32 %v587_v30, %v600_v40  ;;  %v1191_v30 = vld [vmem:[#allocation11 + $0x60] sm:$0xf]  ;;  %v1201_v40 = vld [vmem:[#allocation11 + $0x78] sm:$0xf0] }
 0x18a   : > { %v1192_v32 = vor.u32 %v1300_v31, %v1191_v30  ;;  %v1204_v43 = vor.u32 %v1299_v39, %v1201_v40 }
 0x18b   : > { %v604_v42 = vmul.f32 %v1901_v41, %v1901_v41  ;;  %881 = vmatpush.bf16.msra.mxu2 %v1164_v1 }
 0x18c   : > { %865 = vmatpush.bf16.msra.mxu1 %v1192_v32  ;;  %907 = vmatpush.bf16.msrb.mxu0 %v1204_v43 }
 0x18d   : > { %607 = vadd.xlane.f32.xlu1 %v604_v42  ;;  %894 = vmatpush.bf16.msra.mxu3 %v1184_v55 }
 0x18f   : > { %882 = vmatpush.bf16.msra.mxu2 %v1148_v14 }
 0x190   : > { %866 = vmatpush.bf16.msra.mxu1 %v1176_v48  ;;  %908 = vmatpush.bf16.msrb.mxu0 %v1188_v56 }
 0x191   : > { %895 = vmatpush.bf16.msra.mxu3 %v1168_v2 }
 0x194   : > { %867 = vmatpush.bf16.msra.mxu1 %v1160_v60  ;;  %909 = vmatpush.bf16.msrb.mxu0 %v1172_v7 }
 0x195   : > { %896 = vmatpush.bf16.msra.mxu3 %v1152_v22 }
 0x198   : > { %868 = vmatpush.bf16.msra.mxu1 %v1144_v13 }
 0x1f8   : > { %v606_v36 = vpop.xlane.xlu1 %605 }
 0x1f9   : > { %v609_v42 = vmul.f32 %v606_v36, %v1893_v20 }
 0x1fb   : > { %v1906_v47 = vadd.f32 1e-05, %v609_v42 }
 0x1fd   : > { %1444 = vrsqrt.f32 %v1906_v47  ;;  %vm619_vm10 = vweird.f32 %v1906_v47 }
 0x200   : > { %v608_v0 = vpop.xlane.xlu1 %607 }
 0x201   : > { %v610_v6 = vmul.f32 %v608_v0, %v1893_v20  ;;  %v1156_v20 = vor.u32 %v1287_v18, %v1153_v12 }
 0x203   : > { %v1445_v19 = vpop.eup %1444  ;;  %v612_v21 = vadd.f32 1e-05, %v610_v6  ;;  %910 = vmatpush.bf16.msrb.mxu0 %v1156_v20 }
 0x204   : > { %v614_v23 = vmul.f32 %v1445_v19, %v1906_v47  ;;  %vm620_vm9 = vweird.f32 %v1445_v19 }
 0x205   : > { %1446 = vrsqrt.f32 %v612_v21  ;;  %vm621_vm11 = vmor %vm619_vm10, %vm620_vm9  ;;  %vm629_vm13 = vweird.f32 %v612_v21 }
 0x206   : > { %v615_v24 = vmul.f32 %v1445_v19, %v614_v23 }
 0x208   : > { %v616_v25 = vmul.f32 0.5, %v615_v24 }
 0x20a   : > { %v617_v26 = vsub.f32 1.5, %v616_v25 }
 0x20b   : > { %v1447_v27 = vpop.eup %1446 }
 0x20c   : > { %v618_v28 = vmul.f32 %v1445_v19, %v617_v26  ;;  %v624_v29 = vmul.f32 %v1447_v27, %v612_v21  ;;  %vm630_vm12 = vweird.f32 %v1447_v27 }
 0x20d   : > { %vm631_vm14 = vmor %vm629_vm13, %vm630_vm12 }
 0x20e   : > { %v625_v30 = vmul.f32 %v1447_v27, %v624_v29  ;;  %v622_v31 = vsel %vm621_vm11, %v1445_v19, %v618_v28 }
 0x20f   : > { %v633_v34 = vmul.f32 %v622_v31, %v1896_v38  ;;  %v685_v38 = vld [vmem:[%s1962_s6] sm:$0xf] }
 0x210   : > { %v626_v11 = vmul.f32 0.5, %v625_v30  ;;  %v687_v47 = vperm.slane %v685_v38, 0  ;;  %v690_v49 = vperm.slane %v685_v38, 3  ;;  %v689_v50 = vperm.slane %v685_v38, 2 }
 0x211   : > { %v639_v17 = vmul.f32 %v1436_v33, %v633_v34 }
 0x212   : > { %v627_v32 = vsub.f32 1.5, %v626_v11 }
 0x213   : > { %v645_v42 = vadd.f32 %v1437_v37, %v639_v17 }
 0x214   : > { %v628_v35 = vmul.f32 %v1447_v27, %v627_v32 }
 0x216   : > { %v632_v36 = vsel %vm631_vm14, %v1447_v27, %v628_v35 }
 0x217   : > { %v634_v39 = vmul.f32 %v632_v36, %v1901_v41  ;;  %v688_v41 = vperm.slane %v685_v38, 1 }
 0x219   : > { %v640_v40 = vmul.f32 %v1436_v33, %v634_v39 }
 0x21b   : > { %v646_v43 = vadd.f32 %v1437_v37, %v640_v40 }
 0x21d   : > { %v1323_v44 = vpack.c.bf16 %v646_v43, %v645_v42 }
 0x21f   : > { %1324 = vst [vmem:[#allocation2] sm:$0xff] %v1323_v44  }
 0x226   : > { %v1285_v45 = vld [vmem:[#allocation2] sm:$0xff] }
 0x227   : > { %869 = vmatmul.bf16.vlgmr.msra.gmra.mxu1 %v1285_v45  ;;  %883 = vmatmul.bf16.vlgmr.msra.gmra.mxu2 %v1285_v45 }
 0x228   : > { %897 = vmatmul.bf16.vlgmr.msra.gmra.mxu3 %v1285_v45  ;;  %911 = vmatmul.bf16.vlgmr.msrb.gmra.mxu0 %v1285_v45 }
 0x2a4   : > { %v870_v46 = vpop.f32.mrf.mxu1 }
 0x2a5   : > { %v912_v48 = vpop.f32.mrf.mxu0  ;;  %v871_v52 = vadd.f32 %v870_v46, %v687_v47 }
 0x2a6   : > { %v913_v55 = vadd.f32 %v912_v48, %v690_v49 }
 0x2aa   : > { %v884_v51 = vpop.f32.mrf.mxu2 }
 0x2ab   : > { %v885_v53 = vadd.f32 %v884_v51, %v688_v41  ;;  %v898_v54 = vpop.f32.mrf.mxu3 }
 0x2ac   : > { %v899_v56 = vadd.f32 %v898_v54, %v689_v50  ;;  %v872_v59 = vpop.f32.mrf.mxu1 }
 0x2ad   : > { %v917_v57 = vpack.c.bf16 %v885_v53, %v871_v52  ;;  %v914_v60 = vpop.f32.mrf.mxu0  ;;  %v873_v62 = vadd.f32 %v872_v59, %v687_v47 }
 0x2ae   : > { %v918_v58 = vpack.c.bf16 %v913_v55, %v899_v56  ;;  %v915_v1 = vadd.f32 %v914_v60, %v690_v49 }
 0x2af   : > { %921 = vst [vmem:[%s396_s23] sm:$0xff] %v917_v57 }
 0x2b0   : > { %922 = vst [vmem:[%s396_s23 + $0x8] sm:$0xff] %v918_v58 }
 0x2b2   : > { %v886_v61 = vpop.f32.mrf.mxu2 }
 0x2b3   : > { %v887_v63 = vadd.f32 %v886_v61, %v688_v41  ;;  %v900_v0 = vpop.f32.mrf.mxu3 }
 0x2b4   : > { %v901_v2 = vadd.f32 %v900_v0, %v689_v50 }
 0x2b5   : > { %v919_v3 = vpack.c.bf16 %v887_v63, %v873_v62 }
 0x2b6   : > { %v920_v4 = vpack.c.bf16 %v915_v1, %v901_v2 }
 0x2b7   : > { %923 = vst [vmem:[%s396_s23 + $0x10] sm:$0xff] %v919_v3 }
 0x2b8   : > { %924 = vst [vmem:[%s396_s23 + $0x18] sm:$0xff] %v920_v4 }
 0x2b9   : > { %1625 = shalt.err (!%p1622_p0)
}
 0x2ba   : > { %s1699_s20 = smov 256   ;;  %s1700_s9 = smov 16  }
 0x2bb   : > { %1343 = dma.vmem_to_hbm [thread:$0]  (%p1838_p2), %s942_s21, 512, %s944_s12, %s926_s27, %s1699_s20, %s1699_s20, %s1700_s9  }
 0x2bc PF: > { %s958_s10 = sand.u32 1, %s1668_s24   ;;  %p1363_p4 = pnand %p1088_p10, %p1788_p5 }
 0x2bd   : > { %s959_s15 = scalar_lea.sflag [#allocation5], %s958_s10 }
 0x2be   : > { %p1364_p6 = pneg %p1363_p4 }
 0x2c0   : > { %1663 = dma.done.wait (%p1364_p6), %s959_s15, 512  }
 0x2c1   : > { %1665 = vsyncadd (%p1364_p6), %s959_s15, 4294966784  ;;  %s25_s29 = sadd.s32 1, %s1688_s29   ;;  %s1984_s24 = smov %s1672_s25 }
 0x2c2   : > { %p22_p8 = scmp.ge.s32.totalorder %s25_s29, 4   ;;  %s1985_s25 = smov %s1676_s26 }
 0x2c3   : > { %s1986_s26 = smov %s1848_s8  ;;  %s1987_s27 = smov %s1684_s28 }
 0x2c4   : > { %s1988_s28 = smov %s1990_s19  ;;  %24 = sbr.rel (!%p22_p8) target bundleno = 13 (0xd), region = 117 }
 0x2c9   :  { %965 = vsyncpa [#allocation4], 1 }
 0x2ca   :  { %967 = vsyncpa [#allocation4 + $0x1], 1 }
 0x2cb   :  { %968 = vsyncpa [#allocation7], 1 }
 0x2cc   :  { %969 = vsyncpa [#allocation10], 1 }
 0x2cd   :  { %970 = vsyncpa [#allocation5], 1 }
 0x2ce   :  { %972 = vsyncpa [#allocation5 + $0x1], 1 }

</bundles_post_ra>
